<compile_context>
chip_gen: v7x
topology: tpu7x:2x2x1
jax: 0.10.0
libtpu: 0.0.40
codegen_flags: <defaults>
</compile_context>

<pallas_src>
import functools

import jax
import jax.numpy as jnp
from jax.experimental import pallas as pl
from jax.experimental.pallas import tpu as pltpu

SELU_ALPHA = 1.6732632423543772848170429916717
SELU_SCALE = 1.0507009873554804934193349852946
MASK_NEG = 1e9  # finite "minus infinity" for the additive attention mask


def _selu(x):
    return SELU_SCALE * jnp.where(x > 0, x, SELU_ALPHA * (jnp.exp(x) - 1.0))


def _encoder_layer_kernel(h_ref, e_ref, nm_ref, em_ref, bias_ref,
                          wf_ref, bf_ref, wwa_ref, wwb_ref, bw_ref, wqkv_ref,
                          o_ref, *, num_head):
    B, n_a, C = h_ref.shape
    f_e = wf_ref.shape[0]
    nh = num_head
    d = C // nh
    R = B * n_a            # flattened node rows (b, i)
    E = B * n_a * n_a      # flattened edge rows (b, i, j)
    f32 = jnp.float32
    mxu_dt = wqkv_ref.dtype        # bf16 (v6e/v7x option) or f32

    h = h_ref[...]                                     # (B, n_a, C)
    h2 = h.reshape(R, C).astype(f32)

    # ---------------- GraphEncoder ----------------
    ef = e_ref[...].reshape(E, f_e)
    e2 = _selu(jnp.dot(ef, wf_ref[...], preferred_element_type=f32) + bf_ref[...])
    e2 = e2 * em_ref[...].reshape(E, 1)                # edge mask
    e2 = e2.reshape(B, n_a, n_a, C)

    # h1[b,i,f] = sum_j h[b,j,f] * e2[b,i,j,f]
    h1 = jnp.sum(h.astype(f32)[:, None, :, :] * e2, axis=2).reshape(R, C)

    # w(cat[h, h1]) as two accumulating matmuls (no lane concat before the MXU)
    z = (jnp.dot(h2.astype(mxu_dt), wwa_ref[...], preferred_element_type=f32)
         + jnp.dot(h1.astype(mxu_dt), wwb_ref[...], preferred_element_type=f32)
         + bw_ref[...])
    hg2 = _selu(z) * nm_ref[...].reshape(R, C) + h2    # (R, C) residual, f32

    # ---------------- EncoderAttention ----------------
    # fused qkv; 1/temperature already folded into the q columns.
    qkv = jnp.dot(hg2.astype(mxu_dt), wqkv_ref[...], preferred_element_type=f32)
    q = qkv[:, :C].reshape(B, n_a, C)
    k = qkv[:, C:2 * C].reshape(B, n_a, C)
    v = qkv[:, 2 * C:].reshape(B, n_a, C)
    bias = bias_ref[...]                               # (B, n_a, n_a): adj - 1e9*mask

    # Per-head batched matmuls: no (B, n_a, n_a, C) intermediates; softmax is
    # lane-dense over the key axis.  Scores / bias add / softmax stay in f32.
    head_out = []
    for hd in range(nh):
        sl = slice(hd * d, (hd + 1) * d)
        qh = q[:, :, sl].astype(mxu_dt)
        kh = k[:, :, sl].astype(mxu_dt)
        vh = v[:, :, sl].astype(mxu_dt)
        s = jnp.einsum('bid,bjd->bij', qh, kh,
                       preferred_element_type=f32) + bias       # (B, n_a, n_a)
        m = jnp.max(s, axis=-1, keepdims=True)
        w = jnp.exp(s - m)
        inv = pl.reciprocal(jnp.sum(w, axis=-1, keepdims=True), approx=True)
        alpha = w * inv
        head_out.append(jnp.einsum('bij,bjd->bid', alpha.astype(mxu_dt), vh,
                                   preferred_element_type=f32))  # (B, n_a, d)
    attn = jnp.concatenate(head_out, axis=-1)          # (B, n_a, C)

    out = attn + hg2.reshape(B, n_a, C)                # residual
    o_ref[...] = out.astype(o_ref.dtype)


def _auto_block_b(n_b, n_a, C, f_e, num_head, mxu_itemsize, vmem_budget):
    """Graphs per grid step: fill the MXU (R ~ 256 rows), stay inside the VMEM
    budget (intermediates scale with block_b*n_a^2), keep >= 2 grid steps so
    v7x's two TensorCores both get work, and prefer a divisor of n_b."""
    per_graph = (3 * n_a * n_a * C * 4                              # e2 + h1 product (f32)
                 + 2 * n_a * n_a * (f_e * mxu_itemsize + 4 * (num_head + 2))
                 + 24 * n_a * C * 4)                                # node-row slabs
    bb = max(1, min(vmem_budget // max(per_graph, 1), -(-256 // n_a)))
    bb = min(bb, n_b)
    if n_b >= 2:
        bb = min(bb, -(-n_b // 2))          # >= 2 steps for megacore sharding
    for cand in range(bb, 0, -1):           # snap to a divisor of n_b if close
        if n_b % cand == 0:
            if 2 * cand >= bb:
                bb = cand
            break
    return int(bb)


def encoder_layer(h, e, node_mask, edge_mask, attn_mask, adj, params,
                  num_head=4, temperature_coeff=2.0, block_b=None,
                  mxu_dtype=jnp.float32):
    n_b, n_a, C = h.shape
    f_e = e.shape[-1]
    d = C // num_head
    tp = (temperature_coeff * d) ** 0.5
    cdt = jnp.dtype(mxu_dtype)
    f32 = jnp.float32

    # ---- wrapper-side layout / weight prep (free XLA plumbing) ----
    h_in = h.astype(cdt)
    e_flat = e.reshape(n_b, n_a * n_a, f_e).astype(cdt)
    em_flat = edge_mask.reshape(n_b, n_a * n_a, 1).astype(f32)
    nm_full = jnp.broadcast_to(node_mask.astype(f32), (n_b, n_a, C))   # C lanes
    # adjacency + {0,1} attention mask pre-combined into one additive bias;
    # finite -1e9 instead of -inf so fully-masked (padded) rows stay NaN-free.
    # (Those rows differ from the PyTorch -inf/NaN semantics by design.)
    bias = (adj[0] - MASK_NEG * attn_mask[0]).astype(f32)              # (n_b, n_a, n_a)

    wqkv = jnp.concatenate(
        [params["wq_t"] / tp, params["wk_t"], params["wv_t"]], axis=1).astype(cdt)
    wf = params["wf_t"].astype(cdt)
    ww_a = params["ww_t"][:C].astype(cdt)      # applied to h
    ww_b = params["ww_t"][C:].astype(cdt)      # applied to h1
    bf = params["bf"].astype(f32)
    bw = params["bw"].astype(f32)

    # ---- per-generation tiling knobs ----
    try:
        vmem_cap = int(pltpu.get_tpu_info().vmem_capacity_bytes)
    except Exception:
        vmem_cap = 64 * 1024 * 1024            # assume the smallest (v7x) if unknown
    vmem_limit = max(32 * 1024 * 1024,
                     min(100 * 1024 * 1024, (vmem_cap * 3) // 4))
    if block_b is None:
        block_b = _auto_block_b(n_b, n_a, C, f_e, num_head, cdt.itemsize,
                                vmem_limit // 2)
    B = max(1, min(int(block_b), n_b))

    # ---- pad batch to a multiple of the per-step graph block ----
    n_b_pad = -(-n_b // B) * B
    h_p, e_p, nm_p, em_p, bias_p = h_in, e_flat, nm_full, em_flat, bias
    if n_b_pad != n_b:
        pad = n_b_pad - n_b
        pad3 = lambda x: jnp.pad(x, ((0, pad), (0, 0), (0, 0)))
        h_p, e_p, nm_p, em_p, bias_p = map(pad3, (h_p, e_p, nm_p, em_p, bias_p))

    grid_spec = pltpu.PrefetchScalarGridSpec(
        num_scalar_prefetch=0,
        grid=(n_b_pad // B,),
        in_specs=[
            pl.BlockSpec((B, n_a, C), lambda b: (b, 0, 0)),           # h
            pl.BlockSpec((B, n_a * n_a, f_e), lambda b: (b, 0, 0)),   # e
            pl.BlockSpec((B, n_a, C), lambda b: (b, 0, 0)),           # node mask (C lanes)
            pl.BlockSpec((B, n_a * n_a, 1), lambda b: (b, 0, 0)),     # edge mask
            pl.BlockSpec((B, n_a, n_a), lambda b: (b, 0, 0)),         # attn bias (keys in lanes)
            pl.BlockSpec((f_e, C), lambda b: (0, 0)),                 # filter W^T
            pl.BlockSpec((1, C), lambda b: (0, 0)),                   # filter bias
            pl.BlockSpec((C, C), lambda b: (0, 0)),                   # ww (h half)
            pl.BlockSpec((C, C), lambda b: (0, 0)),                   # ww (h1 half)
            pl.BlockSpec((1, C), lambda b: (0, 0)),                   # ww bias
            pl.BlockSpec((C, 3 * C), lambda b: (0, 0)),               # fused qkv
        ],
        out_specs=pl.BlockSpec((B, n_a, C), lambda b: (b, 0, 0)),
    )

    out = pl.pallas_call(
        functools.partial(_encoder_layer_kernel, num_head=num_head),
        out_shape=jax.ShapeDtypeStruct((n_b_pad, n_a, C), jnp.float32),
        grid_spec=grid_spec,
        compiler_params=pltpu.CompilerParams(
            dimension_semantics=("parallel",),
            vmem_limit_bytes=vmem_limit),
    )(h_p, e_p, nm_p, em_p, bias_p, wf, bf, ww_a, ww_b, bw, wqkv)
    return out[:n_b]


def reference(h, e, node_mask, edge_mask, attn_mask, adj, params,
              num_head, temperature_coeff):
    """Pure-JAX mirror of the PyTorch forward (for correctness check)."""
    n_b, n_a, C = h.shape
    d = C // num_head
    tp = (temperature_coeff * d) ** 0.5
    e2 = jax.nn.selu(e @ params["wf_t"] + params["bf"]) * edge_mask
    h1 = jnp.sum(h[:, None, :, :] * e2, axis=-2)
    h1 = jax.nn.selu(jnp.concatenate([h, h1], -1) @ params["ww_t"]
                     + params["bw"]) * node_mask
    hg = h1 + h
    q = (hg @ params["wq_t"]).reshape(n_b, n_a, num_head, d).transpose(2, 0, 1, 3)
    k = (hg @ params["wk_t"]).reshape(n_b, n_a, num_head, d).transpose(2, 0, 3, 1)
    v = (hg @ params["wv_t"]).reshape(n_b, n_a, num_head, d).transpose(2, 0, 1, 3)
    a = q @ k / tp + adj
    a = jnp.where(attn_mask > 0.5, -jnp.inf, a)
    alpha = jax.nn.softmax(a, axis=-1)
    out = (alpha @ v).transpose(1, 2, 0, 3).reshape(n_b, n_a, C)
    return out + hg


if __name__ == "__main__":
    n_b, n_a, C, f_e, nh = 6, 8, 32, 30, 4
    key = jax.random.PRNGKey(0)
    keys = jax.random.split(key, 12)

    h = jax.random.normal(keys[0], (n_b, n_a, C), jnp.float32)
    e = jax.random.normal(keys[1], (n_b, n_a, n_a, f_e), jnp.float32)

    # First 6 of 8 atoms are valid (avoids fully-masked softmax rows in the ref).
    valid = (jnp.arange(n_a) < 6).astype(jnp.float32)
    node_mask = jnp.broadcast_to(valid[None, :, None], (n_b, n_a, 1))
    edge_mask = jnp.broadcast_to(
        (valid[:, None] * valid[None, :])[None, :, :, None], (n_b, n_a, n_a, 1))
    # attention mask: 1.0 => masked; mask out invalid key columns.
    attn_mask = jnp.broadcast_to((1.0 - valid)[None, None, None, :],
                                 (1, n_b, n_a, n_a))
    adjacency = (jax.random.uniform(keys[2], (1, n_b, n_a, n_a)) < 0.3
                 ).astype(jnp.float32)

    params = {
        "wf_t": 0.1 * jax.random.normal(keys[3], (f_e, C), jnp.float32),
        "bf":   0.1 * jax.random.normal(keys[4], (1, C), jnp.float32),
        "ww_t": 0.1 * jax.random.normal(keys[5], (2 * C, C), jnp.float32),
        "bw":   0.1 * jax.random.normal(keys[6], (1, C), jnp.float32),
        "wq_t": 0.1 * jax.random.normal(keys[7], (C, C), jnp.float32),
        "wk_t": 0.1 * jax.random.normal(keys[8], (C, C), jnp.float32),
        "wv_t": 0.1 * jax.random.normal(keys[9], (C, C), jnp.float32),
    }

    ref = reference(h, e, node_mask, edge_mask, attn_mask, adjacency,
                    params, nh, 2.0)

    # f32 path (auto block_b -> 3 graphs/step, 2 grid steps on this shape).
    out = encoder_layer(h, e, node_mask, edge_mask, attn_mask, adjacency,
                        params, num_head=nh, temperature_coeff=2.0)
    out = jax.block_until_ready(out)
    err = float(jnp.max(jnp.abs(out - ref)))
    # Tolerance accounts for the approximate EUP reciprocal in the softmax.
    assert err < 1e-2, f"f32 max abs err = {err}"

    # bf16 MXU-operand variant (v6e/v7x perf suggestion); loose functional check.
    out_bf16 = jax.block_until_ready(
        encoder_layer(h, e, node_mask, edge_mask, attn_mask, adjacency, params,
                      num_head=nh, temperature_coeff=2.0,
                      mxu_dtype=jnp.bfloat16))
    err_bf16 = float(jnp.max(jnp.abs(out_bf16 - ref)))
    assert err_bf16 < 1e-1, f"bf16 max abs err = {err_bf16}"

    print("KERNEL_OK")
</pallas_src>

<mosaic_0001>
module attributes {stable_mosaic.version = 11 : i64} {
  func.func @_encoder_layer_kernel(%arg0: i32, %arg1: memref<3x8x32xf32, #tpu.memory_space<vmem>>, %arg2: memref<3x64x30xf32, #tpu.memory_space<vmem>>, %arg3: memref<3x8x32xf32, #tpu.memory_space<vmem>>, %arg4: memref<3x64x1xf32, #tpu.memory_space<vmem>>, %arg5: memref<3x8x8xf32, #tpu.memory_space<vmem>>, %arg6: memref<30x32xf32, #tpu.memory_space<vmem>>, %arg7: memref<1x32xf32, #tpu.memory_space<vmem>>, %arg8: memref<32x32xf32, #tpu.memory_space<vmem>>, %arg9: memref<32x32xf32, #tpu.memory_space<vmem>>, %arg10: memref<1x32xf32, #tpu.memory_space<vmem>>, %arg11: memref<32x96xf32, #tpu.memory_space<vmem>>, %arg12: memref<3x8x32xf32, #tpu.memory_space<vmem>>) attributes {dimension_semantics = [#tpu.dimension_semantics<parallel>], iteration_bounds = array<i64: 2>, scalar_prefetch = 0 : i64, scratch_operands = 0 : i64, tpu.core_type = #tpu.core_type<tc>, window_params = [{transform_indices = @transform_0, window_bounds = array<i64: 3, 8, 32>}, {transform_indices = @transform_1, window_bounds = array<i64: 3, 64, 30>}, {transform_indices = @transform_2, window_bounds = array<i64: 3, 8, 32>}, {transform_indices = @transform_3, window_bounds = array<i64: 3, 64, 1>}, {transform_indices = @transform_4, window_bounds = array<i64: 3, 8, 8>}, {pipeline_mode = #tpu.pipeline_mode<synchronous>, transform_indices = @transform_5, window_bounds = array<i64: 30, 32>}, {pipeline_mode = #tpu.pipeline_mode<synchronous>, transform_indices = @transform_6, window_bounds = array<i64: 1, 32>}, {pipeline_mode = #tpu.pipeline_mode<synchronous>, transform_indices = @transform_7, window_bounds = array<i64: 32, 32>}, {pipeline_mode = #tpu.pipeline_mode<synchronous>, transform_indices = @transform_8, window_bounds = array<i64: 32, 32>}, {pipeline_mode = #tpu.pipeline_mode<synchronous>, transform_indices = @transform_9, window_bounds = array<i64: 1, 32>}, {pipeline_mode = #tpu.pipeline_mode<synchronous>, transform_indices = @transform_10, window_bounds = array<i64: 32, 96>}, {transform_indices = @transform_11, window_bounds = array<i64: 3, 8, 32>}]} {
    %c0 = arith.constant 0 : index
    %c0_0 = arith.constant 0 : index
    %c0_1 = arith.constant 0 : index
    %0 = vector.load %arg1[%c0, %c0_0, %c0_1] : memref<3x8x32xf32, #tpu.memory_space<vmem>>, vector<3x8x32xf32>
    %1 = vector.shape_cast %0 : vector<3x8x32xf32> to vector<24x32xf32>
    %c0_2 = arith.constant 0 : index
    %c0_3 = arith.constant 0 : index
    %c0_4 = arith.constant 0 : index
    %2 = vector.load %arg2[%c0_2, %c0_3, %c0_4] : memref<3x64x30xf32, #tpu.memory_space<vmem>>, vector<3x64x30xf32>
    %3 = vector.shape_cast %2 : vector<3x64x30xf32> to vector<192x30xf32>
    %c0_5 = arith.constant 0 : index
    %c0_6 = arith.constant 0 : index
    %4 = vector.load %arg6[%c0_5, %c0_6] : memref<30x32xf32, #tpu.memory_space<vmem>>, vector<30x32xf32>
    %cst = arith.constant dense<0.000000e+00> : vector<192x32xf32>
    %5 = tpu.matmul %3, %4, %cst {dimension_numbers = #tpu.dot_dimension_numbers<[1], [0], [0], [1], [0, 0, 1, 1], [], []>} : vector<192x30xf32>, vector<30x32xf32>, vector<192x32xf32> -> vector<192x32xf32>
    %c0_7 = arith.constant 0 : index
    %c0_8 = arith.constant 0 : index
    %6 = vector.load %arg7[%c0_7, %c0_8] : memref<1x32xf32, #tpu.memory_space<vmem>>, vector<1x32xf32>
    %7 = vector.broadcast %6 : vector<1x32xf32> to vector<192x32xf32>
    %8 = arith.addf %5, %7 : vector<192x32xf32>
    %cst_9 = arith.constant 0.000000e+00 : f32
    %9 = vector.broadcast %cst_9 : f32 to vector<192x32xf32>
    %10 = arith.cmpf ogt, %8, %9 : vector<192x32xf32>
    %11 = math.exp %8 : vector<192x32xf32>
    %cst_10 = arith.constant 1.000000e+00 : f32
    %12 = vector.broadcast %cst_10 : f32 to vector<192x32xf32>
    %13 = arith.subf %11, %12 : vector<192x32xf32>
    %cst_11 = arith.constant 1.67326319 : f32
    %14 = vector.broadcast %cst_11 : f32 to vector<192x32xf32>
    %15 = arith.mulf %14, %13 : vector<192x32xf32>
    %16 = arith.select %10, %8, %15 : vector<192x32xi1>, vector<192x32xf32>
    %cst_12 = arith.constant 1.05070102 : f32
    %17 = vector.broadcast %cst_12 : f32 to vector<192x32xf32>
    %18 = arith.mulf %17, %16 : vector<192x32xf32>
    %c0_13 = arith.constant 0 : index
    %c0_14 = arith.constant 0 : index
    %c0_15 = arith.constant 0 : index
    %19 = vector.load %arg4[%c0_13, %c0_14, %c0_15] : memref<3x64x1xf32, #tpu.memory_space<vmem>>, vector<3x64x1xf32>
    %20 = vector.shape_cast %19 : vector<3x64x1xf32> to vector<192x1xf32>
    %21 = vector.broadcast %20 : vector<192x1xf32> to vector<192x32xf32>
    %22 = arith.mulf %18, %21 : vector<192x32xf32>
    %23 = vector.shape_cast %22 : vector<192x32xf32> to vector<3x8x8x32xf32>
    %24 = vector.shape_cast %0 : vector<3x8x32xf32> to vector<3x1x8x32xf32>
    %25 = vector.broadcast %24 : vector<3x1x8x32xf32> to vector<3x8x8x32xf32>
    %26 = arith.mulf %25, %23 : vector<3x8x8x32xf32>
    %cst_16 = arith.constant dense<0.000000e+00> : vector<3x8x32xf32>
    %27 = vector.multi_reduction <add>, %26, %cst_16 [2] : vector<3x8x8x32xf32> to vector<3x8x32xf32>
    %28 = vector.shape_cast %27 : vector<3x8x32xf32> to vector<24x32xf32>
    %c0_17 = arith.constant 0 : index
    %c0_18 = arith.constant 0 : index
    %29 = vector.load %arg8[%c0_17, %c0_18] : memref<32x32xf32, #tpu.memory_space<vmem>>, vector<32x32xf32>
    %cst_19 = arith.constant dense<0.000000e+00> : vector<24x32xf32>
    %30 = tpu.matmul %1, %29, %cst_19 {dimension_numbers = #tpu.dot_dimension_numbers<[1], [0], [0], [1], [0, 0, 1, 1], [], []>} : vector<24x32xf32>, vector<32x32xf32>, vector<24x32xf32> -> vector<24x32xf32>
    %c0_20 = arith.constant 0 : index
    %c0_21 = arith.constant 0 : index
    %31 = vector.load %arg9[%c0_20, %c0_21] : memref<32x32xf32, #tpu.memory_space<vmem>>, vector<32x32xf32>
    %cst_22 = arith.constant dense<0.000000e+00> : vector<24x32xf32>
    %32 = tpu.matmul %28, %31, %cst_22 {dimension_numbers = #tpu.dot_dimension_numbers<[1], [0], [0], [1], [0, 0, 1, 1], [], []>} : vector<24x32xf32>, vector<32x32xf32>, vector<24x32xf32> -> vector<24x32xf32>
    %33 = arith.addf %30, %32 : vector<24x32xf32>
    %c0_23 = arith.constant 0 : index
    %c0_24 = arith.constant 0 : index
    %34 = vector.load %arg10[%c0_23, %c0_24] : memref<1x32xf32, #tpu.memory_space<vmem>>, vector<1x32xf32>
    %35 = vector.broadcast %34 : vector<1x32xf32> to vector<24x32xf32>
    %36 = arith.addf %33, %35 : vector<24x32xf32>
    %cst_25 = arith.constant 0.000000e+00 : f32
    %37 = vector.broadcast %cst_25 : f32 to vector<24x32xf32>
    %38 = arith.cmpf ogt, %36, %37 : vector<24x32xf32>
    %39 = math.exp %36 : vector<24x32xf32>
    %cst_26 = arith.constant 1.000000e+00 : f32
    %40 = vector.broadcast %cst_26 : f32 to vector<24x32xf32>
    %41 = arith.subf %39, %40 : vector<24x32xf32>
    %cst_27 = arith.constant 1.67326319 : f32
    %42 = vector.broadcast %cst_27 : f32 to vector<24x32xf32>
    %43 = arith.mulf %42, %41 : vector<24x32xf32>
    %44 = arith.select %38, %36, %43 : vector<24x32xi1>, vector<24x32xf32>
    %cst_28 = arith.constant 1.05070102 : f32
    %45 = vector.broadcast %cst_28 : f32 to vector<24x32xf32>
    %46 = arith.mulf %45, %44 : vector<24x32xf32>
    %c0_29 = arith.constant 0 : index
    %c0_30 = arith.constant 0 : index
    %c0_31 = arith.constant 0 : index
    %47 = vector.load %arg3[%c0_29, %c0_30, %c0_31] : memref<3x8x32xf32, #tpu.memory_space<vmem>>, vector<3x8x32xf32>
    %48 = vector.shape_cast %47 : vector<3x8x32xf32> to vector<24x32xf32>
    %49 = arith.mulf %46, %48 : vector<24x32xf32>
    %50 = arith.addf %49, %1 : vector<24x32xf32>
    %c0_32 = arith.constant 0 : index
    %c0_33 = arith.constant 0 : index
    %51 = vector.load %arg11[%c0_32, %c0_33] : memref<32x96xf32, #tpu.memory_space<vmem>>, vector<32x96xf32>
    %cst_34 = arith.constant dense<0.000000e+00> : vector<24x96xf32>
    %52 = tpu.matmul %50, %51, %cst_34 {dimension_numbers = #tpu.dot_dimension_numbers<[1], [0], [0], [1], [0, 0, 1, 1], [], []>} : vector<24x32xf32>, vector<32x96xf32>, vector<24x96xf32> -> vector<24x96xf32>
    %53 = vector.extract_strided_slice %52 {offsets = [0, 0], sizes = [24, 32], strides = [1, 1]} : vector<24x96xf32> to vector<24x32xf32>
    %54 = vector.shape_cast %53 : vector<24x32xf32> to vector<3x8x32xf32>
    %55 = vector.extract_strided_slice %52 {offsets = [0, 32], sizes = [24, 32], strides = [1, 1]} : vector<24x96xf32> to vector<24x32xf32>
    %56 = vector.shape_cast %55 : vector<24x32xf32> to vector<3x8x32xf32>
    %57 = vector.extract_strided_slice %52 {offsets = [0, 64], sizes = [24, 32], strides = [1, 1]} : vector<24x96xf32> to vector<24x32xf32>
    %58 = vector.shape_cast %57 : vector<24x32xf32> to vector<3x8x32xf32>
    %c0_35 = arith.constant 0 : index
    %c0_36 = arith.constant 0 : index
    %c0_37 = arith.constant 0 : index
    %59 = vector.load %arg5[%c0_35, %c0_36, %c0_37] : memref<3x8x8xf32, #tpu.memory_space<vmem>>, vector<3x8x8xf32>
    %60 = vector.extract_strided_slice %54 {offsets = [0, 0, 0], sizes = [3, 8, 8], strides = [1, 1, 1]} : vector<3x8x32xf32> to vector<3x8x8xf32>
    %61 = vector.extract_strided_slice %56 {offsets = [0, 0, 0], sizes = [3, 8, 8], strides = [1, 1, 1]} : vector<3x8x32xf32> to vector<3x8x8xf32>
    %62 = vector.extract_strided_slice %58 {offsets = [0, 0, 0], sizes = [3, 8, 8], strides = [1, 1, 1]} : vector<3x8x32xf32> to vector<3x8x8xf32>
    "tpu.trace_start"() <{level = 10 : i32, message = "bid,bjd->bij"}> : () -> ()
    %cst_38 = arith.constant dense<0.000000e+00> : vector<3x8x8xf32>
    %63 = tpu.matmul %60, %61, %cst_38 {dimension_numbers = #tpu.dot_dimension_numbers<[2], [2], [1], [1], [0, 0, 0, 1, 1, 1], [0], [0]>} : vector<3x8x8xf32>, vector<3x8x8xf32>, vector<3x8x8xf32> -> vector<3x8x8xf32>
    "tpu.trace_stop"() : () -> ()
    %64 = arith.addf %63, %59 : vector<3x8x8xf32>
    %cst_39 = arith.constant dense<0xFF800000> : vector<3x8xf32>
    %65 = vector.multi_reduction <maximumf>, %64, %cst_39 [2] : vector<3x8x8xf32> to vector<3x8xf32>
    %66 = vector.shape_cast %65 : vector<3x8xf32> to vector<3x8x1xf32>
    %67 = vector.broadcast %66 : vector<3x8x1xf32> to vector<3x8x8xf32>
    %68 = arith.subf %64, %67 : vector<3x8x8xf32>
    %69 = math.exp %68 : vector<3x8x8xf32>
    %cst_40 = arith.constant dense<0.000000e+00> : vector<3x8xf32>
    %70 = vector.multi_reduction <add>, %69, %cst_40 [2] : vector<3x8x8xf32> to vector<3x8xf32>
    %71 = vector.shape_cast %70 : vector<3x8xf32> to vector<3x8x1xf32>
    %72 = tpu.reciprocal %71 {approx = true} : vector<3x8x1xf32> -> vector<3x8x1xf32>
    %73 = vector.broadcast %72 : vector<3x8x1xf32> to vector<3x8x8xf32>
    %74 = arith.mulf %69, %73 : vector<3x8x8xf32>
    "tpu.trace_start"() <{level = 10 : i32, message = "bij,bjd->bid"}> : () -> ()
    %cst_41 = arith.constant dense<0.000000e+00> : vector<3x8x8xf32>
    %75 = tpu.matmul %74, %62, %cst_41 {dimension_numbers = #tpu.dot_dimension_numbers<[2], [1], [1], [2], [0, 0, 0, 1, 1, 2], [0], [0]>} : vector<3x8x8xf32>, vector<3x8x8xf32>, vector<3x8x8xf32> -> vector<3x8x8xf32>
    "tpu.trace_stop"() : () -> ()
    %76 = vector.extract_strided_slice %54 {offsets = [0, 0, 8], sizes = [3, 8, 8], strides = [1, 1, 1]} : vector<3x8x32xf32> to vector<3x8x8xf32>
    %77 = vector.extract_strided_slice %56 {offsets = [0, 0, 8], sizes = [3, 8, 8], strides = [1, 1, 1]} : vector<3x8x32xf32> to vector<3x8x8xf32>
    %78 = vector.extract_strided_slice %58 {offsets = [0, 0, 8], sizes = [3, 8, 8], strides = [1, 1, 1]} : vector<3x8x32xf32> to vector<3x8x8xf32>
    "tpu.trace_start"() <{level = 10 : i32, message = "bid,bjd->bij"}> : () -> ()
    %cst_42 = arith.constant dense<0.000000e+00> : vector<3x8x8xf32>
    %79 = tpu.matmul %76, %77, %cst_42 {dimension_numbers = #tpu.dot_dimension_numbers<[2], [2], [1], [1], [0, 0, 0, 1, 1, 1], [0], [0]>} : vector<3x8x8xf32>, vector<3x8x8xf32>, vector<3x8x8xf32> -> vector<3x8x8xf32>
    "tpu.trace_stop"() : () -> ()
    %80 = arith.addf %79, %59 : vector<3x8x8xf32>
    %cst_43 = arith.constant dense<0xFF800000> : vector<3x8xf32>
    %81 = vector.multi_reduction <maximumf>, %80, %cst_43 [2] : vector<3x8x8xf32> to vector<3x8xf32>
    %82 = vector.shape_cast %81 : vector<3x8xf32> to vector<3x8x1xf32>
    %83 = vector.broadcast %82 : vector<3x8x1xf32> to vector<3x8x8xf32>
    %84 = arith.subf %80, %83 : vector<3x8x8xf32>
    %85 = math.exp %84 : vector<3x8x8xf32>
    %cst_44 = arith.constant dense<0.000000e+00> : vector<3x8xf32>
    %86 = vector.multi_reduction <add>, %85, %cst_44 [2] : vector<3x8x8xf32> to vector<3x8xf32>
    %87 = vector.shape_cast %86 : vector<3x8xf32> to vector<3x8x1xf32>
    %88 = tpu.reciprocal %87 {approx = true} : vector<3x8x1xf32> -> vector<3x8x1xf32>
    %89 = vector.broadcast %88 : vector<3x8x1xf32> to vector<3x8x8xf32>
    %90 = arith.mulf %85, %89 : vector<3x8x8xf32>
    "tpu.trace_start"() <{level = 10 : i32, message = "bij,bjd->bid"}> : () -> ()
    %cst_45 = arith.constant dense<0.000000e+00> : vector<3x8x8xf32>
    %91 = tpu.matmul %90, %78, %cst_45 {dimension_numbers = #tpu.dot_dimension_numbers<[2], [1], [1], [2], [0, 0, 0, 1, 1, 2], [0], [0]>} : vector<3x8x8xf32>, vector<3x8x8xf32>, vector<3x8x8xf32> -> vector<3x8x8xf32>
    "tpu.trace_stop"() : () -> ()
    %92 = vector.extract_strided_slice %54 {offsets = [0, 0, 16], sizes = [3, 8, 8], strides = [1, 1, 1]} : vector<3x8x32xf32> to vector<3x8x8xf32>
    %93 = vector.extract_strided_slice %56 {offsets = [0, 0, 16], sizes = [3, 8, 8], strides = [1, 1, 1]} : vector<3x8x32xf32> to vector<3x8x8xf32>
    %94 = vector.extract_strided_slice %58 {offsets = [0, 0, 16], sizes = [3, 8, 8], strides = [1, 1, 1]} : vector<3x8x32xf32> to vector<3x8x8xf32>
    "tpu.trace_start"() <{level = 10 : i32, message = "bid,bjd->bij"}> : () -> ()
    %cst_46 = arith.constant dense<0.000000e+00> : vector<3x8x8xf32>
    %95 = tpu.matmul %92, %93, %cst_46 {dimension_numbers = #tpu.dot_dimension_numbers<[2], [2], [1], [1], [0, 0, 0, 1, 1, 1], [0], [0]>} : vector<3x8x8xf32>, vector<3x8x8xf32>, vector<3x8x8xf32> -> vector<3x8x8xf32>
    "tpu.trace_stop"() : () -> ()
    %96 = arith.addf %95, %59 : vector<3x8x8xf32>
    %cst_47 = arith.constant dense<0xFF800000> : vector<3x8xf32>
    %97 = vector.multi_reduction <maximumf>, %96, %cst_47 [2] : vector<3x8x8xf32> to vector<3x8xf32>
    %98 = vector.shape_cast %97 : vector<3x8xf32> to vector<3x8x1xf32>
    %99 = vector.broadcast %98 : vector<3x8x1xf32> to vector<3x8x8xf32>
    %100 = arith.subf %96, %99 : vector<3x8x8xf32>
    %101 = math.exp %100 : vector<3x8x8xf32>
    %cst_48 = arith.constant dense<0.000000e+00> : vector<3x8xf32>
    %102 = vector.multi_reduction <add>, %101, %cst_48 [2] : vector<3x8x8xf32> to vector<3x8xf32>
    %103 = vector.shape_cast %102 : vector<3x8xf32> to vector<3x8x1xf32>
    %104 = tpu.reciprocal %103 {approx = true} : vector<3x8x1xf32> -> vector<3x8x1xf32>
    %105 = vector.broadcast %104 : vector<3x8x1xf32> to vector<3x8x8xf32>
    %106 = arith.mulf %101, %105 : vector<3x8x8xf32>
    "tpu.trace_start"() <{level = 10 : i32, message = "bij,bjd->bid"}> : () -> ()
    %cst_49 = arith.constant dense<0.000000e+00> : vector<3x8x8xf32>
    %107 = tpu.matmul %106, %94, %cst_49 {dimension_numbers = #tpu.dot_dimension_numbers<[2], [1], [1], [2], [0, 0, 0, 1, 1, 2], [0], [0]>} : vector<3x8x8xf32>, vector<3x8x8xf32>, vector<3x8x8xf32> -> vector<3x8x8xf32>
    "tpu.trace_stop"() : () -> ()
    %108 = vector.extract_strided_slice %54 {offsets = [0, 0, 24], sizes = [3, 8, 8], strides = [1, 1, 1]} : vector<3x8x32xf32> to vector<3x8x8xf32>
    %109 = vector.extract_strided_slice %56 {offsets = [0, 0, 24], sizes = [3, 8, 8], strides = [1, 1, 1]} : vector<3x8x32xf32> to vector<3x8x8xf32>
    %110 = vector.extract_strided_slice %58 {offsets = [0, 0, 24], sizes = [3, 8, 8], strides = [1, 1, 1]} : vector<3x8x32xf32> to vector<3x8x8xf32>
    "tpu.trace_start"() <{level = 10 : i32, message = "bid,bjd->bij"}> : () -> ()
    %cst_50 = arith.constant dense<0.000000e+00> : vector<3x8x8xf32>
    %111 = tpu.matmul %108, %109, %cst_50 {dimension_numbers = #tpu.dot_dimension_numbers<[2], [2], [1], [1], [0, 0, 0, 1, 1, 1], [0], [0]>} : vector<3x8x8xf32>, vector<3x8x8xf32>, vector<3x8x8xf32> -> vector<3x8x8xf32>
    "tpu.trace_stop"() : () -> ()
    %112 = arith.addf %111, %59 : vector<3x8x8xf32>
    %cst_51 = arith.constant dense<0xFF800000> : vector<3x8xf32>
    %113 = vector.multi_reduction <maximumf>, %112, %cst_51 [2] : vector<3x8x8xf32> to vector<3x8xf32>
    %114 = vector.shape_cast %113 : vector<3x8xf32> to vector<3x8x1xf32>
    %115 = vector.broadcast %114 : vector<3x8x1xf32> to vector<3x8x8xf32>
    %116 = arith.subf %112, %115 : vector<3x8x8xf32>
    %117 = math.exp %116 : vector<3x8x8xf32>
    %cst_52 = arith.constant dense<0.000000e+00> : vector<3x8xf32>
    %118 = vector.multi_reduction <add>, %117, %cst_52 [2] : vector<3x8x8xf32> to vector<3x8xf32>
    %119 = vector.shape_cast %118 : vector<3x8xf32> to vector<3x8x1xf32>
    %120 = tpu.reciprocal %119 {approx = true} : vector<3x8x1xf32> -> vector<3x8x1xf32>
    %121 = vector.broadcast %120 : vector<3x8x1xf32> to vector<3x8x8xf32>
    %122 = arith.mulf %117, %121 : vector<3x8x8xf32>
    "tpu.trace_start"() <{level = 10 : i32, message = "bij,bjd->bid"}> : () -> ()
    %cst_53 = arith.constant dense<0.000000e+00> : vector<3x8x8xf32>
    %123 = tpu.matmul %122, %110, %cst_53 {dimension_numbers = #tpu.dot_dimension_numbers<[2], [1], [1], [2], [0, 0, 0, 1, 1, 2], [0], [0]>} : vector<3x8x8xf32>, vector<3x8x8xf32>, vector<3x8x8xf32> -> vector<3x8x8xf32>
    "tpu.trace_stop"() : () -> ()
    %124 = tpu.concatenate %75, %91, %107, %123 in 2 : vector<3x8x8xf32>, vector<3x8x8xf32>, vector<3x8x8xf32>, vector<3x8x8xf32> -> vector<3x8x32xf32>
    %125 = vector.shape_cast %50 : vector<24x32xf32> to vector<3x8x32xf32>
    %126 = arith.addf %124, %125 : vector<3x8x32xf32>
    %c0_54 = arith.constant 0 : index
    %c0_55 = arith.constant 0 : index
    %c0_56 = arith.constant 0 : index
    %127 = vector.load %arg12[%c0_54, %c0_55, %c0_56] : memref<3x8x32xf32, #tpu.memory_space<vmem>>, vector<3x8x32xf32>
    tpu.vector_store %arg12[%c0_54, %c0_55, %c0_56], %126 {strides = array<i32>} : memref<3x8x32xf32, #tpu.memory_space<vmem>>, vector<3x8x32xf32>,
    return
  }
  func.func @transform_0(%arg0: i32) -> (i32, i32, i32) {
    %c0_i32 = arith.constant 0 : i32
    %c0_i32_0 = arith.constant 0 : i32
    %c0_i32_1 = arith.constant 0 : i32
    return %arg0, %c0_i32, %c0_i32_0 : i32, i32, i32
  }
  func.func @transform_1(%arg0: i32) -> (i32, i32, i32) {
    %c0_i32 = arith.constant 0 : i32
    %c0_i32_0 = arith.constant 0 : i32
    %c0_i32_1 = arith.constant 0 : i32
    return %arg0, %c0_i32, %c0_i32_0 : i32, i32, i32
  }
  func.func @transform_2(%arg0: i32) -> (i32, i32, i32) {
    %c0_i32 = arith.constant 0 : i32
    %c0_i32_0 = arith.constant 0 : i32
    %c0_i32_1 = arith.constant 0 : i32
    return %arg0, %c0_i32, %c0_i32_0 : i32, i32, i32
  }
  func.func @transform_3(%arg0: i32) -> (i32, i32, i32) {
    %c0_i32 = arith.constant 0 : i32
    %c0_i32_0 = arith.constant 0 : i32
    %c0_i32_1 = arith.constant 0 : i32
    return %arg0, %c0_i32, %c0_i32_0 : i32, i32, i32
  }
  func.func @transform_4(%arg0: i32) -> (i32, i32, i32) {
    %c0_i32 = arith.constant 0 : i32
    %c0_i32_0 = arith.constant 0 : i32
    %c0_i32_1 = arith.constant 0 : i32
    return %arg0, %c0_i32, %c0_i32_0 : i32, i32, i32
  }
  func.func @transform_5(%arg0: i32) -> (i32, i32) {
    %c0_i32 = arith.constant 0 : i32
    %c0_i32_0 = arith.constant 0 : i32
    %c0_i32_1 = arith.constant 0 : i32
    return %c0_i32, %c0_i32_0 : i32, i32
  }
  func.func @transform_6(%arg0: i32) -> (i32, i32) {
    %c0_i32 = arith.constant 0 : i32
    %c0_i32_0 = arith.constant 0 : i32
    %c0_i32_1 = arith.constant 0 : i32
    return %c0_i32, %c0_i32_0 : i32, i32
  }
  func.func @transform_7(%arg0: i32) -> (i32, i32) {
    %c0_i32 = arith.constant 0 : i32
    %c0_i32_0 = arith.constant 0 : i32
    %c0_i32_1 = arith.constant 0 : i32
    return %c0_i32, %c0_i32_0 : i32, i32
  }
  func.func @transform_8(%arg0: i32) -> (i32, i32) {
    %c0_i32 = arith.constant 0 : i32
    %c0_i32_0 = arith.constant 0 : i32
    %c0_i32_1 = arith.constant 0 : i32
    return %c0_i32, %c0_i32_0 : i32, i32
  }
  func.func @transform_9(%arg0: i32) -> (i32, i32) {
    %c0_i32 = arith.constant 0 : i32
    %c0_i32_0 = arith.constant 0 : i32
    %c0_i32_1 = arith.constant 0 : i32
    return %c0_i32, %c0_i32_0 : i32, i32
  }
  func.func @transform_10(%arg0: i32) -> (i32, i32) {
    %c0_i32 = arith.constant 0 : i32
    %c0_i32_0 = arith.constant 0 : i32
    %c0_i32_1 = arith.constant 0 : i32
    return %c0_i32, %c0_i32_0 : i32, i32
  }
  func.func @transform_11(%arg0: i32) -> (i32, i32, i32) {
    %c0_i32 = arith.constant 0 : i32
    %c0_i32_0 = arith.constant 0 : i32
    %c0_i32_1 = arith.constant 0 : i32
    return %arg0, %c0_i32, %c0_i32_0 : i32, i32, i32
  }
}

</mosaic_0001>

<bundles_post_ra>
// kernel: tpu_custom_call.1
= control target key start
LH: loop header
LB: loop body
LE: loop exit
PB: predicated region body
PF: predicated region fallthrough
CT: control target
= control target key end

     0   :  { %s5546_s0 = inlined_call_operand.vmem [shape: f32[6,8,32], index: 0, kind: input, shape index: {}]   ;;  %s5547_s1 = inlined_call_operand.vmem [shape: f32[6,64,30], index: 1, kind: input, shape index: {}]   ;;  %s5548_s2 = inlined_call_operand.vmem [shape: f32[6,8,32], index: 2, kind: input, shape index: {}]   ;;  %s5549_s3 = inlined_call_operand.vmem [shape: f32[6,64,1], index: 3, kind: input, shape index: {}]   ;;  %s5550_s4 = inlined_call_operand.vmem [shape: f32[6,8,8], index: 4, kind: input, shape index: {}]   ;;  %s5551_s5 = inlined_call_operand.vmem [shape: f32[30,32], index: 5, kind: input, shape index: {}]   ;;  %s5552_s6 = inlined_call_operand.vmem [shape: f32[1,32], index: 6, kind: input, shape index: {}]   ;;  %s5553_s7 = inlined_call_operand.vmem [shape: f32[32,32], index: 7, kind: input, shape index: {}]   ;;  %s5554_s8 = inlined_call_operand.vmem [shape: f32[32,32], index: 8, kind: input, shape index: {}]   ;;  %s5555_s9 = inlined_call_operand.vmem [shape: f32[1,32], index: 9, kind: input, shape index: {}]   ;;  %s5556_s10 = inlined_call_operand.vmem [shape: f32[32,96], index: 10, kind: input, shape index: {}]   ;;  %s5557_s11 = inlined_call_operand.hbm [shape: f32[6,8,32], index: 11, kind: output, shape index: {}]  }
   0x1   :  { %5559 = sst [smem:[#allocation5_spill]] %s5546_s0 }
   0x2   :  { %16 = vsyncpa [#allocation3], 0 }
   0x3   :  { %18 = vsyncpa [#allocation3 + $0x1], 0  ;;  %s4603_s17 = smov 0   ;;  %s4605_s18 = smov 0  }
   0x4   :  { %s4607_s19 = smov 0   ;;  %s4609_s20 = smov 0  }
   0x5 LB: > { %s4624_s21 = sadd.s32 4294967295, %s4520_s20   ;;  %s3837_s22 = sadd.s32 4294967294, %s4520_s20   ;;  %s4520_s20 = sphi %s4609_s20, %s5567_s20   ;;  %s4516_s19 = sphi %s4607_s19, %s5566_s19   ;;  %s4512_s18 = sphi %s4605_s18, %s5565_s18   ;;  %s4508_s17 = sphi %s4603_s17, %s5564_s17  }
   0x6   : > { %s4628_s23 = sadd.s32 1, %s4520_s20   ;;  %s287_s24 = sadd.s32 1, %s4516_s19 }
   0x7   : > { %s284_s25 = ssub.s32 %s4520_s20, %s4628_s23  ;;  %p297_p0 = scmp.ne.s32.totalorder %s4516_s19, %s4512_s18 }
   0x8   : > { %p285_p1 = scmp.eq.s32.totalorder %s284_s25, 0  ;;  %p298_p2 = scmp.eq.s32.totalorder %s4624_s21, 1 }
   0x9   : > { %p303_p3 = scmp.ne.s32.totalorder %s4512_s18, %s4508_s17  ;;  %p304_p4 = scmp.eq.s32.totalorder %s3837_s22, 1 }
   0xa   : > { %s4639_s26 = scalar_select %p285_p1, %s4516_s19, %s287_s24  }
   0xb   : > { %p4641_p5 = por %p298_p2, %p297_p0  ;;  %p4645_p6 = por %p304_p4, %p303_p3 }
   0xc   : > { %p3840_p7 = scmp.ge.s32.totalorder %s4520_s20, 1  ;;  %p387_p8 = scmp.lt.s32.totalorder %s4520_s20, 3 }
   0xe   : > { %p388_p9 = pnand %p3840_p7, %p387_p8 }
   0xf   : > { %v509_v0 = vld [vmem:[%s5551_s5] sm:$0xff] (!%p388_p9)  ;;  %v510_v1 = vld [vmem:[%s5551_s5 + $0x8] sm:$0xff] (!%p388_p9)  ;;  %v511_v2 = vld [vmem:[%s5551_s5 + $0x10] sm:$0xff] (!%p388_p9)  ;;  %vm593_vm0 = vcmask (!%p388_p9), 1045504   ;;  %s449_s16 = smul.u32 (!%p388_p9), 3, %s4624_s21  ;;  %vm4522_vm1 = vmmov (!%p388_p9), 1  }
  0x10   : > { %391 = sbr.rel (%p388_p9) target bundleno = 3519 (0xdbf), region = 64  ;;  %v4265_v3 = vpack.c.bf16 (!%p388_p9), %v510_v1, %v509_v0  ;;  %v512_v4 = vld [vmem:[%s5551_s5 + $0x18] sm:$0x3f] (!%p388_p9)  ;;  %vm4270_vm2 = vmpackc.low (!%p388_p9), %vm593_vm0, %vm4522_vm1  ;;  %v4523_v6 = vmov (!%p388_p9), 0   ;;  %vm520_vm3 = vcmask (!%p388_p9), 244736   ;;  %v1315_v55 = vld [vmem:[%s5554_s8] sm:$0xff] (!%p388_p9) }
  0x11   : > { %v4269_v5 = vpack.c.bf16 (!%p388_p9), %v512_v4, %v511_v2  ;;  %p450_p10 = scmp.lt.s32.totalorder (!%p388_p9), %s449_s16, 5  ;;  %4353 = vset.pattern.permute.xlu0 (!%p388_p9), %v4523_v6  ;;  %4354 = vset.pattern.permute.xlu1 (!%p388_p9), %v4523_v6  ;;  %v1316_v56 = vld [vmem:[%s5554_s8 + $0x8] sm:$0xff] (!%p388_p9)  ;;  %v4524_v58 = vmov (!%p388_p9), 0.0|0.0   ;;  %v1317_v59 = vld [vmem:[%s5554_s8 + $0x10] sm:$0xff] (!%p388_p9)  ;;  %v1318_v60 = vld [vmem:[%s5554_s8 + $0x18] sm:$0xff] (!%p388_p9)  ;;  %vm4525_vm4 = vmmov (!%p388_p9), 0  }
  0x12   : > { %4266 = vmatprep.subr.bf16.mxu0 (!%p388_p9), %v4265_v3  ;;  %v4276_v57 = vpack.c.bf16 (!%p388_p9), %v1316_v56, %v1315_v55  ;;  %4275 = vmatprep.subr.bf16.mxu1 (!%p388_p9), %v4524_v58  ;;  %v4279_v61 = vpack.c.bf16 (!%p388_p9), %v1318_v60, %v1317_v59  ;;  %v4526_v62 = vmov (!%p388_p9), 0.0   ;;  %v4772_v63 = vld [vmem:[%s5552_s6] ss:$0 sm:$0xff] (!%p388_p9)  ;;  %s5562_s0 = sld [smem:[#allocation5_spill]] (!%p388_p9)  ;;  %vm1142_vm6 = vcmask (!%p388_p9), 261120   ;;  %s4531_s13 = smov (!%p388_p9), 56  }
  0x13   : > { %4268 = vmatpush3.bf16.msra.mxu0 (!%p388_p9), %v4265_v3  ;;  %4102 = vmatprep.mubr.msk.f32.mxu1 (!%p388_p9), %vm4525_vm4, %v4526_v62  ;;  %s4532_s14 = smov (!%p388_p9), 80   ;;  %s4535_s22 = smov (!%p388_p9), 104  }
  0x14   : > { %4271 = vmatprep.subr.msk.bf16.mxu0 (!%p388_p9), %vm4270_vm2, %v4269_v5  ;;  %4277 = vmatpush3.bf16.msra.mxu1 (!%p388_p9), %v4276_v57 }
  0x15   : > { %4278 = vmatprep.subr.bf16.mxu1 (!%p388_p9), %v4524_v58 }
  0x17   : > { %s5569_s16 = smov (!%p450_p10, %s449_s16), 5  ;;  %4274 = vmatpush3.bf16.msk.msra.mxu0 %vm4270_vm2, %v4269_v5 }
  0x18   : > { %s3950_s25 = sshll.u32 %s5569_s16, 6  ;;  %4280 = vmatpush3.bf16.msra.mxu1 %v4279_v61  ;;  %4160 = vmatprep.subr.mxu0 %v4526_v62  ;;  %s4799_s24 = sshll.u32 %s5569_s16, 3 }
  0x19   : > { %s4670_s12 = scalar_lea.vmem %s5547_s1, %s3950_s25  ;;  %s4683_s15 = scalar_lea.vmem %s5549_s3, %s3950_s25  ;;  %4281 = vmatprep.subr.bf16.mxu1 %v4524_v58 }
  0x1a   : > { %v485_v7 = vld [vmem:[%s4670_s12] sm:$0xff]  ;;  %v486_v8 = vld [vmem:[%s4670_s12 + $0x8] sm:$0xff]  ;;  %v487_v9 = vld [vmem:[%s4670_s12 + $0x10] sm:$0xff]  ;;  %s4807_s30 = scalar_lea.vmem %s5562_s0, %s4799_s24  ;;  %s479_s29 = scalar_lea.vmem %s5550_s4, %s4799_s24 }
  0x1b   : > { %4058 = vmatprep.mubr.msk.f32.mxu0 %vm520_vm3, %v485_v7  ;;  %v488_v10 = vld [vmem:[%s4670_s12 + $0x18] sm:$0xff]  ;;  %v489_v11 = vld [vmem:[%s4670_s12 + $0x20] sm:$0xff]  ;;  %v490_v12 = vld [vmem:[%s4670_s12 + $0x28] sm:$0xff]  ;;  %s4529_s16 = smov 120   ;;  %s4536_s25 = smov 72  }
  0x1c   : > { %4059 = vmatmul.mubr.msk.f32.vlgmr.msra.gmra.mrb[0].mxu0 %vm520_vm3, %v486_v8  ;;  %v950_v13 = vld [vmem:[%s4683_s15] sm:$0xff]  ;;  %v952_v14 = vld [vmem:[%s4683_s15 + $0x10] sm:$0xff]  ;;  %v951_v16 = vld [vmem:[%s4683_s15 + $0x8] sm:$0xff] }
  0x1d   : > { %4061 = vmatprep.mubr.msk.f32.mxu0 %vm520_vm3, %v487_v9  ;;  %v491_v15 = vld [vmem:[%s4670_s12 + $0x30] sm:$0xff]  ;;  %976 = vperm.xlu0 %4353, %v950_v13   ;;  %v953_v17 = vld [vmem:[%s4683_s15 + $0x18] sm:$0xff]  ;;  %v493_v19 = vld [vmem:[%s4670_s12 + $0x40] sm:$0xff] }
  0x1e   : > { %986 = vperm.xlu1 %4354, %v952_v14   ;;  %v492_v18 = vld [vmem:[%s4670_s12 + $0x38] sm:$0xff]  ;;  %v954_v20 = vld [vmem:[%s4683_s15 + $0x20] sm:$0xff]  ;;  %v955_v21 = vld [vmem:[%s4683_s15 + $0x28] sm:$0xff] }
  0x1f   : > { %v494_v22 = vld [vmem:[%s4670_s12 + $0x48] sm:$0xff]  ;;  %v495_v23 = vld [vmem:[%s4670_s12 + $0x50] sm:$0xff]  ;;  %v958_v24 = vld [vmem:[%s4683_s15 + $0x40] sm:$0xff] }
  0x20   : > { %4062 = vmatmul.mubr.msk.f32.gmra.mrb[2].mxu0 %vm520_vm3, %v488_v10  ;;  %v959_v25 = vld [vmem:[%s4683_s15 + $0x48] sm:$0xff]  ;;  %v496_v26 = vld [vmem:[%s4670_s12 + $0x58] sm:$0xff]  ;;  %v497_v27 = vld [vmem:[%s4670_s12 + $0x60] sm:$0xff] }
  0x21   : > { %4064 = vmatprep.mubr.msk.f32.mxu0 %vm520_vm3, %v489_v11  ;;  %981 = vperm.xlu0 %4353, %v951_v16   ;;  %v956_v28 = vld [vmem:[%s4683_s15 + $0x30] sm:$0xff]  ;;  %v498_v30 = vld [vmem:[%s4670_s12 + $0x68] sm:$0xff]  ;;  %v957_v32 = vld [vmem:[%s4683_s15 + $0x38] sm:$0xff] }
  0x22   : > { %991 = vperm.xlu1 %4354, %v953_v17   ;;  %v960_v29 = vld [vmem:[%s4683_s15 + $0x50] sm:$0xff]  ;;  %v961_v33 = vld [vmem:[%s4683_s15 + $0x58] sm:$0xff]  ;;  %v501_v35 = vld [vmem:[%s4670_s12 + $0x80] sm:$0xff] }
  0x23   : > { %v499_v31 = vld [vmem:[%s4670_s12 + $0x70] sm:$0xff]  ;;  %v500_v34 = vld [vmem:[%s4670_s12 + $0x78] sm:$0xff]  ;;  %v962_v36 = vld [vmem:[%s4683_s15 + $0x60] sm:$0xff] }
  0x24   : > { %4065 = vmatmul.mubr.msk.f32.gmra.mrb[4].mxu0 %vm520_vm3, %v490_v12  ;;  %v963_v37 = vld [vmem:[%s4683_s15 + $0x68] sm:$0xff]  ;;  %v503_v39 = vld [vmem:[%s4670_s12 + $0x90] sm:$0xff]  ;;  %v966_v40 = vld [vmem:[%s4683_s15 + $0x80] sm:$0xff] }
  0x25   : > { %4067 = vmatprep.mubr.msk.f32.mxu0 %vm520_vm3, %v491_v15  ;;  %996 = vperm.xlu0 %4353, %v954_v20   ;;  %v502_v38 = vld [vmem:[%s4670_s12 + $0x88] sm:$0xff]  ;;  %v504_v42 = vld [vmem:[%s4670_s12 + $0x98] sm:$0xff]  ;;  %v505_v43 = vld [vmem:[%s4670_s12 + $0xa0] sm:$0xff] }
  0x26   : > { %1001 = vperm.xlu1 %4354, %v955_v21   ;;  %v967_v41 = vld [vmem:[%s4683_s15 + $0x88] sm:$0xff]  ;;  %v964_v44 = vld [vmem:[%s4683_s15 + $0x70] sm:$0xff]  ;;  %v965_v48 = vld [vmem:[%s4683_s15 + $0x78] sm:$0xff] }
  0x27   : > { %v968_v45 = vld [vmem:[%s4683_s15 + $0x90] sm:$0xff]  ;;  %v506_v46 = vld [vmem:[%s4670_s12 + $0xa8] sm:$0xff]  ;;  %v969_v49 = vld [vmem:[%s4683_s15 + $0x98] sm:$0xff] }
  0x28   : > { %4068 = vmatmul.mubr.msk.f32.gmra.mrb[6].mxu0 %vm520_vm3, %v492_v18  ;;  %v507_v47 = vld [vmem:[%s4670_s12 + $0xb0] sm:$0xff]  ;;  %v508_v50 = vld [vmem:[%s4670_s12 + $0xb8] sm:$0xff]  ;;  %v970_v51 = vld [vmem:[%s4683_s15 + $0xa0] sm:$0xff]  ;;  %s4530_s12 = smov 88  }
  0x29   : > { %4070 = vmatprep.mubr.msk.f32.mxu0 %vm520_vm3, %v493_v19  ;;  %1016 = vperm.xlu0 %4353, %v958_v24   ;;  %v971_v52 = vld [vmem:[%s4683_s15 + $0xa8] sm:$0xff]  ;;  %v972_v53 = vld [vmem:[%s4683_s15 + $0xb0] sm:$0xff]  ;;  %v973_v54 = vld [vmem:[%s4683_s15 + $0xb8] sm:$0xff]  ;;  %s466_s15 = scalar_lea.vmem %s5548_s2, %s4799_s24  ;;  %s4528_s24 = smov 64  }
  0x2a   : > { %1021 = vperm.xlu1 %4354, %v959_v25  }
  0x2c   : > { %4071 = vmatmul.mubr.msk.f32.gmra.mrb[8].mxu0 %vm520_vm3, %v494_v22 }
  0x2d   : > { %4073 = vmatprep.mubr.msk.f32.mxu0 %vm520_vm3, %v495_v23  ;;  %1006 = vperm.xlu0 %4353, %v956_v28  }
  0x2e   : > { %1026 = vperm.xlu1 %4354, %v960_v29  }
  0x30   : > { %4074 = vmatmul.mubr.msk.f32.gmra.mrb[10].mxu0 %vm520_vm3, %v496_v26 }
  0x31   : > { %4076 = vmatprep.mubr.msk.f32.mxu0 %vm520_vm3, %v497_v27  ;;  %1011 = vperm.xlu0 %4353, %v957_v32  }
  0x32   : > { %1031 = vperm.xlu1 %4354, %v961_v33  }
  0x34   : > { %4077 = vmatmul.mubr.msk.f32.gmra.mrb[12].mxu0 %vm520_vm3, %v498_v30 }
  0x35   : > { %4079 = vmatprep.mubr.msk.f32.mxu0 %vm520_vm3, %v499_v31  ;;  %1036 = vperm.xlu0 %4353, %v962_v36  }
  0x36   : > { %1041 = vperm.xlu1 %4354, %v963_v37  }
  0x38   : > { %4080 = vmatmul.mubr.msk.f32.gmra.mrb[14].mxu0 %vm520_vm3, %v500_v34 }
  0x39   : > { %4082 = vmatprep.mubr.msk.f32.mxu0 %vm520_vm3, %v501_v35  ;;  %1056 = vperm.xlu0 %4353, %v966_v40  }
  0x3a   : > { %1061 = vperm.xlu1 %4354, %v967_v41  }
  0x3c   : > { %4083 = vmatmul.mubr.msk.f32.gmra.mrb[16].mxu0 %vm520_vm3, %v502_v38 }
  0x3d   : > { %4085 = vmatprep.mubr.msk.f32.mxu0 %vm520_vm3, %v503_v39  ;;  %1046 = vperm.xlu0 %4353, %v964_v44  }
  0x3e   : > { %1066 = vperm.xlu1 %4354, %v968_v45  }
  0x40   : > { %4086 = vmatmul.mubr.msk.f32.gmra.mrb[18].mxu0 %vm520_vm3, %v504_v42  ;;  %v4819_v42 = vld [vmem:[%s4807_s30] sm:$0xff] }
  0x41   : > { %4088 = vmatprep.mubr.msk.f32.mxu0 %vm520_vm3, %v505_v43  ;;  %1051 = vperm.xlu0 %4353, %v965_v48  }
  0x42   : > { %1071 = vperm.xlu1 %4354, %v969_v49  }
  0x44   : > { %4089 = vmatmul.mubr.msk.f32.gmra.mrb[20].mxu0 %vm520_vm3, %v506_v46 }
  0x45   : > { %4091 = vmatprep.mubr.msk.f32.mxu0 %vm520_vm3, %v507_v47  ;;  %1076 = vperm.xlu0 %4353, %v970_v51  }
  0x46   : > { %1081 = vperm.xlu1 %4354, %v971_v52  }
  0x48   : > { %4092 = vmatmul.mubr.msk.f32.gmra.mrb[22].mxu0 %vm520_vm3, %v508_v50 }
  0x49   : > { %1086 = vperm.xlu0 %4353, %v972_v53   ;;  %4162 = vmatprep.mubr.msk.f32.mxu0 %vm4525_vm4, %v4526_v62 }
  0x4a   : > { %1091 = vperm.xlu1 %4354, %v973_v54  }
  0x9c   : > { %v977_v17 = vpop.permute.xlu0 %976 }
  0x9d   : > { %v987_v29 = vpop.permute.xlu1 %986 }
  0xa0   : > { %v982_v32 = vpop.permute.xlu0 %981 }
  0xa1   : > { %v992_v51 = vpop.permute.xlu1 %991 }
  0xa4   : > { %v997_v56 = vpop.permute.xlu0 %996 }
  0xef   : > { %v4060_v0 = vpop.f32.mrb[0].mxu0 }
  0xf0   : > { %v669_v1 = vadd.f32 %v4060_v0, %v4772_v63  ;;  %v663_v2 = vpop.f32.mrb[1].mxu0 }
  0xf1   : > { %v664_v3 = vadd.f32 %v4772_v63, %v663_v2 }
  0xf2   : > { %v808_v4 = vmul.f32 1.442695, %v669_v1  ;;  %vm783_vm5 = vcmp.gt.f32.partialorder %v669_v1, 0.0 }
  0xf3   : > { %v806_v5 = vmul.f32 1.442695, %v664_v3  ;;  %v4063_v6 = vpop.f32.mrb[2].mxu0  ;;  %vm782_vm7 = vcmp.gt.f32.partialorder %v664_v3, 0.0 }
  0xf4   : > { %4355 = vpow2.f32 %v808_v4  ;;  %v4777_v7 = vadd.f32 %v4063_v6, %v4772_v63  ;;  %v673_v8 = vpop.f32.mrb[3].mxu0 }
  0xf5   : > { %4357 = vpow2.f32 %v806_v5  ;;  %v4780_v9 = vadd.f32 %v4772_v63, %v673_v8 }
  0xf6   : > { %v812_v10 = vmul.f32 1.442695, %v4777_v7  ;;  %vm785_vm8 = vcmp.gt.f32.partialorder %v4777_v7, 0.0 }
  0xf7   : > { %v810_v11 = vmul.f32 1.442695, %v4780_v9  ;;  %v4066_v12 = vpop.f32.mrb[4].mxu0  ;;  %vm784_vm9 = vcmp.gt.f32.partialorder %v4780_v9, 0.0 }
  0xf8   : > { %4359 = vpow2.f32 %v812_v10  ;;  %v4785_v13 = vadd.f32 %v4066_v12, %v4772_v63  ;;  %v683_v14 = vpop.f32.mrb[5].mxu0 }
  0xf9   : > { %4361 = vpow2.f32 %v810_v11  ;;  %v4788_v15 = vadd.f32 %v4772_v63, %v683_v14 }
  0xfa   : > { %v816_v16 = vmul.f32 1.442695, %v4785_v13  ;;  %vm787_vm10 = vcmp.gt.f32.partialorder %v4785_v13, 0.0 }
  0xfb   : > { %v814_v18 = vmul.f32 1.442695, %v4788_v15  ;;  %v4069_v19 = vpop.f32.mrb[6].mxu0  ;;  %vm786_vm11 = vcmp.gt.f32.partialorder %v4788_v15, 0.0 }
  0xfc   : > { %4363 = vpow2.f32 %v816_v16  ;;  %v4793_v20 = vadd.f32 %v4069_v19, %v4772_v63  ;;  %v693_v21 = vpop.f32.mrb[7].mxu0 }
  0xfd   : > { %4365 = vpow2.f32 %v814_v18  ;;  %v4796_v22 = vadd.f32 %v4772_v63, %v693_v21 }
  0xfe   : > { %v4356_v23 = vpop.eup %4355  ;;  %v820_v24 = vmul.f32 1.442695, %v4793_v20  ;;  %vm789_vm12 = vcmp.gt.f32.partialorder %v4793_v20, 0.0 }
  0xff   : > { %v4358_v25 = vpop.eup %4357  ;;  %v3875_v26 = vadd.f32 -1.0, %v4356_v23  ;;  %v818_v27 = vmul.f32 1.442695, %v4796_v22  ;;  %v4072_v28 = vpop.f32.mrb[8].mxu0  ;;  %vm788_vm13 = vcmp.gt.f32.partialorder %v4796_v22, 0.0 }
 0x100   : > { %v3874_v30 = vadd.f32 -1.0, %v4358_v25  ;;  %4367 = vpow2.f32 %v820_v24  ;;  %v703_v31 = vpop.f32.mrb[9].mxu0  ;;  %v4810_v34 = vadd.f32 %v4072_v28, %v4772_v63  ;;  %v4854_v28 = vpop.permute.xlu0 %1016 }
 0x101   : > { %v879_v33 = vmul.f32 1.6732632, %v3875_v26  ;;  %4369 = vpow2.f32 %v818_v27  ;;  %v4813_v37 = vadd.f32 %v4772_v63, %v703_v31  ;;  %v1002_v27 = vpop.permute.xlu1 %1001 }
 0x102   : > { %v4360_v35 = vpop.eup %4359  ;;  %v878_v36 = vmul.f32 1.6732632, %v3874_v30  ;;  %v824_v49 = vmul.f32 1.442695, %v4810_v34  ;;  %vm791_vm14 = vcmp.gt.f32.partialorder %v4810_v34, 0.0 }
 0x103   : > { %v4362_v38 = vpop.eup %4361  ;;  %v903_v39 = vsel %vm783_vm5, %v669_v1, %v879_v33  ;;  %v3877_v40 = vadd.f32 -1.0, %v4360_v35  ;;  %v4816_v41 = vpop.f32.mrb[10].mxu0  ;;  %v822_v54 = vmul.f32 1.442695, %v4813_v37  ;;  %vm790_vm15 = vcmp.gt.f32.partialorder %v4813_v37, 0.0 }
 0x104   : > { %v927_v43 = vmul.f32 1.050701, %v903_v39  ;;  %v902_v44 = vsel %vm782_vm7, %v664_v3, %v878_v36  ;;  %v3876_v45 = vadd.f32 -1.0, %v4362_v38  ;;  %v4822_v46 = vpop.f32.mrb[11].mxu0  ;;  %4371 = vpow2.f32 %v824_v49 }
 0x105   : > { %v926_v47 = vmul.f32 1.050701, %v902_v44  ;;  %v881_v48 = vmul.f32 1.6732632, %v3877_v40  ;;  %4373 = vpow2.f32 %v822_v54 }
 0x106   : > { %v4364_v50 = vpop.eup %4363  ;;  %v1095_v52 = vmul.f32 %v982_v32, %v927_v43  ;;  %v880_v53 = vmul.f32 1.6732632, %v3876_v45 }
 0x107   : > { %v4366_v55 = vpop.eup %4365  ;;  %v1094_v57 = vmul.f32 %v977_v17, %v926_v47  ;;  %v905_v59 = vsel %vm785_vm8, %v4777_v7, %v881_v48  ;;  %v3879_v60 = vadd.f32 -1.0, %v4364_v50  ;;  %v4831_v61 = vpop.f32.mrb[12].mxu0 }
 0x108   : > { %v1119_v0 = vmul.f32 %v1095_v52, %v4819_v42  ;;  %v929_v1 = vmul.f32 1.050701, %v905_v59  ;;  %v904_v2 = vsel %vm784_vm9, %v4780_v9, %v880_v53  ;;  %v3878_v3 = vadd.f32 -1.0, %v4366_v55  ;;  %v4837_v4 = vpop.f32.mrb[13].mxu0  ;;  %v4873_v59 = vld [vmem:[%s5553_s7] sm:$0xff] }
 0x109   : > { %v1118_v5 = vmul.f32 %v1094_v57, %v4819_v42  ;;  %v928_v6 = vmul.f32 1.050701, %v904_v2  ;;  %v883_v8 = vmul.f32 1.6732632, %v3879_v60  ;;  %v4878_v60 = vld [vmem:[%s5553_s7 + $0x8] sm:$0xff] }
 0x10a   : > { %v4368_v7 = vpop.eup %4367  ;;  %v1150_v10 = vsel %vm1142_vm6, %v1119_v0, 0.0  ;;  %v1097_v11 = vmul.f32 %v992_v51, %v929_v1  ;;  %v882_v12 = vmul.f32 1.6732632, %v3878_v3  ;;  %v1007_v1 = vpop.permute.xlu0 %1006 }
 0x10b   : > { %v4370_v14 = vpop.eup %4369  ;;  %v1151_v16 = vrot.slane %v1150_v10, 4  ;;  %v1143_v9 = vsel %vm1142_vm6, %v1118_v5, 0.0  ;;  %v1096_v17 = vmul.f32 %v987_v29, %v928_v6  ;;  %v907_v18 = vsel %vm787_vm10, %v4785_v13, %v883_v8  ;;  %v4846_v19 = vpop.f32.mrb[14].mxu0  ;;  %v4889_v8 = vld [vmem:[%s5553_s7 + $0x10] sm:$0xff] }
 0x10c   : > { %v1144_v21 = vrot.slane %v1143_v9, 4  ;;  %v1121_v23 = vmul.f32 %v1097_v11, %v4819_v42  ;;  %v931_v24 = vmul.f32 1.050701, %v907_v18  ;;  %v906_v25 = vsel %vm786_vm11, %v4788_v15, %v882_v12  ;;  %v4852_v26 = vpop.f32.mrb[15].mxu0 }
 0x10d   : > { %v1152_v29 = vadd.f32 %v1151_v16, %v1150_v10  ;;  %v1120_v30 = vmul.f32 %v1096_v17, %v4819_v42  ;;  %v930_v31 = vmul.f32 1.050701, %v906_v25  ;;  %v3881_v13 = vadd.f32 -1.0, %v4368_v7  ;;  %v4894_v7 = vld [vmem:[%s5553_s7 + $0x18] sm:$0xff] }
 0x10e   : > { %v1145_v32 = vadd.f32 %v1144_v21, %v1143_v9  ;;  %v1164_v33 = vsel %vm1142_vm6, %v1121_v23, 0.0  ;;  %v1099_v35 = vmul.f32 %v1002_v27, %v931_v24  ;;  %v3880_v36 = vadd.f32 -1.0, %v4370_v14  ;;  %v4372_v0 = vpop.eup %4371 }
 0x10f   : > { %v1153_v38 = vrot.slane %v1152_v29, 2  ;;  %v1165_v39 = vrot.slane %v1164_v33, 4  ;;  %v1157_v40 = vsel %vm1142_vm6, %v1120_v30, 0.0  ;;  %v1098_v15 = vmul.f32 %v997_v56, %v930_v31  ;;  %v4859_v43 = vpop.f32.mrb[16].mxu0  ;;  %v4374_v10 = vpop.eup %4373 }
 0x110   : > { %v1146_v44 = vrot.slane %v1145_v32, 2  ;;  %v1158_v45 = vrot.slane %v1157_v40, 4  ;;  %v1123_v47 = vmul.f32 %v1099_v35, %v4819_v42  ;;  %v885_v48 = vmul.f32 1.6732632, %v3881_v13  ;;  %v4862_v49 = vpop.f32.mrb[17].mxu0 }
 0x111   : > { %v1154_v50 = vadd.f32 %v1153_v38, %v1152_v29  ;;  %v1166_v51 = vadd.f32 %v1165_v39, %v1164_v33  ;;  %v1122_v52 = vmul.f32 %v1098_v15, %v4819_v42  ;;  %v884_v53 = vmul.f32 1.6732632, %v3880_v36  ;;  %v1012_v33 = vpop.permute.xlu0 %1011 }
 0x112   : > { %v1147_v54 = vadd.f32 %v1146_v44, %v1145_v32  ;;  %v1159_v55 = vadd.f32 %v1158_v45, %v1157_v40  ;;  %v1178_v57 = vsel %vm1142_vm6, %v1123_v47, 0.0  ;;  %v4868_v56 = vadd.f32 %v4816_v41, %v4772_v63 }
 0x113   : > { %v1167_v2 = vrot.slane %v1166_v51, 2  ;;  %v1179_v3 = vrot.slane %v1178_v57, 4  ;;  %v1171_v5 = vsel %vm1142_vm6, %v1122_v52, 0.0  ;;  %v909_v41 = vsel %vm789_vm12, %v4793_v20, %v885_v48  ;;  %v4884_v6 = vpop.f32.mrb[18].mxu0 }
 0x114   : > { %v1172_v11 = vrot.slane %v1171_v5, 4  ;;  %v4897_v12 = vpop.f32.mrb[19].mxu0  ;;  %v1155_v14 = vrot.slane %v1154_v50, 1  ;;  %v1160_v20 = vrot.slane %v1159_v55, 2  ;;  %v908_v16 = vsel %vm788_vm13, %v4796_v22, %v884_v53 }
 0x115   : > { %v4282_v9 = vpack.c.bf16 %v4878_v60, %v4873_v59  ;;  %v1148_v17 = vrot.slane %v1147_v54, 1  ;;  %v1168_v18 = vadd.f32 %v1167_v2, %v1166_v51  ;;  %v933_v21 = vmul.f32 1.050701, %v909_v41 }
 0x116   : > { %v4285_v23 = vpack.c.bf16 %v4894_v7, %v4889_v8  ;;  %v1180_v24 = vadd.f32 %v1179_v3, %v1178_v57  ;;  %v932_v25 = vmul.f32 1.050701, %v908_v16  ;;  %v3883_v27 = vadd.f32 -1.0, %v4372_v0  ;;  %v4927_v0 = vld [vmem:[%s4807_s30 + $0x8] sm:$0xff] }
 0x117   : > { %v828_v29 = vmul.f32 1.442695, %v4868_v56  ;;  %v4905_v30 = vpop.f32.mrb[20].mxu0  ;;  %v1173_v31 = vadd.f32 %v1172_v11, %v1171_v5  ;;  %v3882_v22 = vadd.f32 -1.0, %v4374_v10  ;;  %v4910_v13 = vadd.f32 %v4772_v63, %v4822_v46 }
 0x118   : > { %v4912_v32 = vpop.f32.mrb[21].mxu0  ;;  %v4914_v35 = vadd.f32 %v1155_v14, %v1154_v50  ;;  %v1161_v36 = vadd.f32 %v1160_v20, %v1159_v55  ;;  %v887_v38 = vmul.f32 1.6732632, %v3883_v27  ;;  %v4917_v39 = vadd.f32 %v1148_v17, %v1147_v54  ;;  %v1022_v54 = vpop.permute.xlu1 %1021 }
 0x119   : > { %v1169_v40 = vrot.slane %v1168_v18, 1  ;;  %v1101_v15 = vmul.f32 %v1012_v33, %v933_v21  ;;  %v886_v44 = vmul.f32 1.6732632, %v3882_v22  ;;  %v1181_v45 = vrot.slane %v1180_v24, 2 }
 0x11a   : > { %v1100_v47 = vmul.f32 %v1007_v1, %v932_v25  ;;  %v911_v46 = vsel %vm791_vm14, %v4810_v34, %v887_v38  ;;  %4375 = vpow2.f32 %v828_v29  ;;  %v1174_v51 = vrot.slane %v1173_v31, 2 }
 0x11b   : > { %v4920_v48 = vpop.f32.mrb[22].mxu0  ;;  %v935_v50 = vmul.f32 1.050701, %v911_v46  ;;  %v910_v52 = vsel %vm790_vm15, %v4813_v37, %v886_v44  ;;  %v826_v53 = vmul.f32 1.442695, %v4910_v13  ;;  %v1162_v57 = vrot.slane %v1161_v36, 1 }
 0x11c   : > { %v4924_v55 = vpop.f32.mrb[23].mxu0  ;;  %v934_v2 = vmul.f32 1.050701, %v910_v52  ;;  %v4931_v1 = vadd.f32 %v4831_v61, %v4772_v63  ;;  %v4935_v34 = vadd.f32 %v4772_v63, %v4837_v4  ;;  %v1125_v3 = vmul.f32 %v1101_v15, %v4819_v42 }
 0x11d   : > { %v1103_v37 = vmul.f32 %v1022_v54, %v935_v50  ;;  %4377 = vpow2.f32 %v826_v53  ;;  %v4940_v5 = vadd.f32 %v4846_v19, %v4772_v63  ;;  %v4942_v41 = vadd.f32 %v1169_v40, %v1168_v18  ;;  %v4960_v18 = vpop.permute.xlu0 %1036 }
 0x11e   : > { %v1124_v10 = vmul.f32 %v1100_v47, %v4819_v42  ;;  %v1102_v11 = vmul.f32 %v4854_v28, %v934_v2  ;;  %v832_v61 = vmul.f32 1.442695, %v4931_v1  ;;  %v4947_v14 = vadd.f32 %v1181_v45, %v1180_v24 }
 0x11f   : > { %v4949_v4 = vadd.f32 %v1174_v51, %v1173_v31  ;;  %v1127_v20 = vmul.f32 %v1103_v37, %v4927_v0  ;;  %v830_v16 = vmul.f32 1.442695, %v4935_v34  ;;  %vm793_vm0 = vcmp.gt.f32.partialorder %v4868_v56, 0.0 }
 0x120   : > { %v1126_v17 = vmul.f32 %v1102_v11, %v4927_v0  ;;  %4379 = vpow2.f32 %v832_v61  ;;  %v836_v19 = vmul.f32 1.442695, %v4940_v5  ;;  %v4958_v28 = vadd.f32 %v4772_v63, %v4852_v26  ;;  %v1027_v26 = vpop.permute.xlu1 %1026 }
 0x121   : > { %v1206_v21 = vsel %vm1142_vm6, %v1127_v20, 0.0  ;;  %4381 = vpow2.f32 %v830_v16  ;;  %v4965_v24 = vadd.f32 %v4859_v43, %v4772_v63  ;;  %v4969_v25 = vadd.f32 %v4772_v63, %v4862_v49  ;;  %v4991_v54 = vpop.permute.xlu0 %1056 }
 0x122   : > { %v1185_v27 = vsel %vm1142_vm6, %v1124_v10, 0.0  ;;  %v1207_v29 = vrot.slane %v1206_v21, 4  ;;  %v1199_v31 = vsel %vm1142_vm6, %v1126_v17, 0.0  ;;  %4383 = vpow2.f32 %v836_v19 }
 0x123   : > { %v4974_v22 = vsel %vm1142_vm6, %v1125_v3, 0.0  ;;  %v1200_v33 = vrot.slane %v1199_v31, 4  ;;  %vm792_vm1 = vcmp.gt.f32.partialorder %v4910_v13, 0.0  ;;  %v834_v43 = vmul.f32 1.442695, %v4958_v28 }
 0x124   : > { %v840_v38 = vmul.f32 1.442695, %v4965_v24  ;;  %v4376_v40 = vpop.eup %4375  ;;  %v4979_v49 = vadd.f32 %v1162_v57, %v1161_v36  ;;  %v1208_v15 = vadd.f32 %v1207_v29, %v1206_v21  ;;  %v838_v44 = vmul.f32 1.442695, %v4969_v25  ;;  %v1032_v10 = vpop.permute.xlu1 %1031 }
 0x125   : > { %v4984_v45 = vadd.f32 %v4884_v6, %v4772_v63  ;;  %v1186_v47 = vrot.slane %v1185_v27, 4  ;;  %v1201_v46 = vadd.f32 %v1200_v33, %v1199_v31  ;;  %v3885_v51 = vadd.f32 -1.0, %v4376_v40  ;;  %v1047_v40 = vpop.permute.xlu0 %1046 }
 0x126   : > { %4385 = vpow2.f32 %v834_v43  ;;  %v1193_v50 = vrot.slane %v4974_v22, 4  ;;  %v1209_v52 = vrot.slane %v1208_v15, 2  ;;  %v4989_v53 = vadd.f32 %v4772_v63, %v4897_v12 }
 0x127   : > { %4387 = vpow2.f32 %v840_v38  ;;  %v4378_v36 = vpop.eup %4377  ;;  %v1176_v57 = vrot.slane %v4949_v4, 1  ;;  %v1202_v2 = vrot.slane %v1201_v46, 2  ;;  %v889_v6 = vmul.f32 1.6732632, %v3885_v51 }
 0x128   : > { %4389 = vpow2.f32 %v838_v44  ;;  %v3884_v3 = vadd.f32 -1.0, %v4378_v36  ;;  %vm795_vm2 = vcmp.gt.f32.partialorder %v4931_v1, 0.0  ;;  %vm794_vm3 = vcmp.gt.f32.partialorder %v4935_v34, 0.0 }
 0x129   : > { %v844_v37 = vmul.f32 1.442695, %v4984_v45  ;;  %v4997_v11 = vadd.f32 %v1186_v47, %v1185_v27  ;;  %v4999_v12 = vadd.f32 %v1209_v52, %v1208_v15  ;;  %v913_v61 = vsel %vm793_vm0, %v4868_v56, %v889_v6  ;;  %v1042_v6 = vpop.permute.xlu1 %1041 }
 0x12a   : > { %v5006_v20 = vadd.f32 %v4905_v30, %v4772_v63  ;;  %v4380_v16 = vpop.eup %4379  ;;  %v5008_v17 = vadd.f32 %v1202_v2, %v1201_v46  ;;  %v937_v19 = vmul.f32 1.050701, %v913_v61  ;;  %v888_v21 = vmul.f32 1.6732632, %v3884_v3 }
 0x12b   : > { %v842_v29 = vmul.f32 1.442695, %v4989_v53  ;;  %v4382_v31 = vpop.eup %4381  ;;  %v3887_v27 = vadd.f32 -1.0, %v4380_v16  ;;  %vm797_vm5 = vcmp.gt.f32.partialorder %v4940_v5, 0.0  ;;  %vm796_vm7 = vcmp.gt.f32.partialorder %v4958_v28, 0.0 }
 0x12c   : > { %v848_v33 = vmul.f32 1.442695, %v5006_v20  ;;  %v4384_v56 = vpop.eup %4383  ;;  %v1105_v43 = vmul.f32 %v1032_v10, %v937_v19  ;;  %v912_v30 = vsel %vm792_vm1, %v4910_v13, %v888_v21  ;;  %v3886_v38 = vadd.f32 -1.0, %v4382_v31 }
 0x12d   : > { %4391 = vpow2.f32 %v844_v37  ;;  %v1211_v15 = vrot.slane %v4999_v12, 1  ;;  %v936_v44 = vmul.f32 1.050701, %v912_v30  ;;  %v891_v47 = vmul.f32 1.6732632, %v3887_v27 }
 0x12e   : > { %v3889_v46 = vadd.f32 -1.0, %v4384_v56  ;;  %v1204_v51 = vrot.slane %v5008_v17, 1  ;;  %v1129_v52 = vmul.f32 %v1105_v43, %v4927_v0  ;;  %v890_v36 = vmul.f32 1.6732632, %v3886_v38  ;;  %v1052_v38 = vpop.permute.xlu0 %1051 }
 0x12f   : > { %4393 = vpow2.f32 %v842_v29  ;;  %v1104_v3 = vmul.f32 %v1027_v26, %v936_v44  ;;  %v915_v13 = vsel %vm795_vm2, %v4931_v1, %v891_v47  ;;  %vm799_vm8 = vcmp.gt.f32.partialorder %v4965_v24, 0.0 }
 0x130   : > { %v4386_v2 = vpop.eup %4385  ;;  %v893_v37 = vmul.f32 1.6732632, %v3889_v46  ;;  %4395 = vpow2.f32 %v848_v33  ;;  %v1220_v61 = vsel %vm1142_vm6, %v1129_v52, 0.0  ;;  %v939_v16 = vmul.f32 1.050701, %v915_v13 }
 0x131   : > { %v4388_v10 = vpop.eup %4387  ;;  %v914_v19 = vsel %vm794_vm3, %v4935_v34, %v890_v36  ;;  %v3888_v21 = vadd.f32 -1.0, %v4386_v2  ;;  %v1221_v31 = vrot.slane %v1220_v61, 4  ;;  %v1128_v26 = vmul.f32 %v1104_v3, %v4927_v0  ;;  %v1062_v3 = vpop.permute.xlu1 %1061 }
 0x132   : > { %v4390_v29 = vpop.eup %4389  ;;  %v938_v27 = vmul.f32 1.050701, %v914_v19  ;;  %v917_v1 = vsel %vm797_vm5, %v4940_v5, %v893_v37  ;;  %vm798_vm9 = vcmp.gt.f32.partialorder %v4969_v25, 0.0  ;;  %v1107_v33 = vmul.f32 %v1042_v6, %v939_v16 }
 0x133   : > { %v941_v56 = vmul.f32 1.050701, %v917_v1  ;;  %v892_v43 = vmul.f32 1.6732632, %v3888_v21  ;;  %v3891_v30 = vadd.f32 -1.0, %v4388_v10  ;;  %v1222_v44 = vadd.f32 %v1221_v31, %v1220_v61 }
 0x134   : > { %v1213_v34 = vsel %vm1142_vm6, %v1128_v26, 0.0  ;;  %v1106_v47 = vmul.f32 %v4960_v18, %v938_v27  ;;  %v3890_v46 = vadd.f32 -1.0, %v4390_v29  ;;  %v1131_v36 = vmul.f32 %v1107_v33, %v4927_v0 }
 0x135   : > { %v1214_v52 = vrot.slane %v1213_v34, 4  ;;  %v1109_v2 = vmul.f32 %v1052_v38, %v941_v56  ;;  %v916_v5 = vsel %vm796_vm7, %v4958_v28, %v892_v43  ;;  %v1223_v6 = vrot.slane %v1222_v44, 2 }
 0x136   : > { %v1130_v13 = vmul.f32 %v1106_v47, %v4927_v0  ;;  %v940_v37 = vmul.f32 1.050701, %v916_v5  ;;  %v895_v10 = vmul.f32 1.6732632, %v3891_v30  ;;  %v1234_v19 = vsel %vm1142_vm6, %v1131_v36, 0.0  ;;  %v1067_v36 = vpop.permute.xlu1 %1066 }
 0x137   : > { %v4392_v61 = vpop.eup %4391  ;;  %v1215_v16 = vadd.f32 %v1214_v52, %v1213_v34  ;;  %v1133_v18 = vmul.f32 %v1109_v2, %v4927_v0  ;;  %v894_v21 = vmul.f32 1.6732632, %v3890_v46  ;;  %v1224_v29 = vadd.f32 %v1223_v6, %v1222_v44  ;;  %v5071_v6 = vld [vmem:[%s4807_s30 + $0x10] sm:$0xff] }
 0x138   : > { %v1235_v31 = vrot.slane %v1234_v19, 4  ;;  %v1227_v26 = vsel %vm1142_vm6, %v1130_v13, 0.0  ;;  %v1108_v27 = vmul.f32 %v1047_v40, %v940_v37  ;;  %v919_v56 = vsel %vm799_vm8, %v4965_v24, %v895_v10 }
 0x139   : > { %v4394_v1 = vpop.eup %4393  ;;  %v1216_v28 = vrot.slane %v1215_v16, 2  ;;  %v1228_v33 = vrot.slane %v1227_v26, 4  ;;  %vm801_vm10 = vcmp.gt.f32.partialorder %v4984_v45, 0.0  ;;  %vm800_vm11 = vcmp.gt.f32.partialorder %v4989_v53, 0.0 }
 0x13a   : > { %v5050_v43 = vadd.f32 %v4772_v63, %v4912_v32  ;;  %v4396_v30 = vpop.eup %4395  ;;  %v1225_v38 = vrot.slane %v1224_v29, 1  ;;  %v1236_v44 = vadd.f32 %v1235_v31, %v1234_v19  ;;  %v5053_v40 = vsel %vm1142_vm6, %v1133_v18, 0.0 }
 0x13b   : > { %v1132_v34 = vmul.f32 %v1108_v27, %v4927_v0  ;;  %v1217_v47 = vadd.f32 %v1216_v28, %v1215_v16  ;;  %v1229_v46 = vadd.f32 %v1228_v33, %v1227_v26  ;;  %v943_v24 = vmul.f32 1.050701, %v919_v56 }
 0x13c   : > { %v918_v52 = vsel %vm798_vm9, %v4969_v25, %v894_v21  ;;  %v5062_v32 = vadd.f32 %v1211_v15, %v4999_v12  ;;  %v5067_v2 = vadd.f32 %v1204_v51, %v5008_v17  ;;  %v1237_v37 = vrot.slane %v1236_v44, 2 }
 0x13d   : > { %v1241_v5 = vsel %vm1142_vm6, %v1132_v34, 0.0  ;;  %v942_v13 = vmul.f32 1.050701, %v918_v52  ;;  %v1249_v10 = vrot.slane %v5053_v40, 4  ;;  %v1111_v25 = vmul.f32 %v1062_v3, %v943_v24 }
 0x13e   : > { %vm803_vm12 = vcmp.gt.f32.partialorder %v5006_v20, 0.0  ;;  %v846_v16 = vmul.f32 1.442695, %v5050_v43  ;;  %v5076_v12 = vadd.f32 %v1225_v38, %v1224_v29  ;;  %v3893_v19 = vadd.f32 -1.0, %v4392_v61  ;;  %v1072_v61 = vpop.permute.xlu1 %1071 }
 0x13f   : > { %v1110_v15 = vmul.f32 %v4991_v54, %v942_v13  ;;  %v3892_v17 = vadd.f32 -1.0, %v4394_v1  ;;  %v1218_v51 = vrot.slane %v1217_v47, 1  ;;  %v1230_v18 = vrot.slane %v1229_v46, 2 }
 0x140   : > { %v1242_v21 = vrot.slane %v1241_v5, 4  ;;  %v1135_v31 = vmul.f32 %v1111_v25, %v5071_v6  ;;  %v897_v27 = vmul.f32 1.6732632, %v3893_v19  ;;  %v3895_v3 = vadd.f32 -1.0, %v4396_v30 }
 0x141   : > { %v1134_v26 = vmul.f32 %v1110_v15, %v5071_v6  ;;  %v896_v28 = vmul.f32 1.6732632, %v3892_v17  ;;  %v5081_v33 = vadd.f32 %v1237_v37, %v1236_v44  ;;  %4397 = vpow2.f32 %v846_v16 }
 0x142   : > { %v1262_v56 = vsel %vm1142_vm6, %v1135_v31, 0.0  ;;  %v5086_v54 = vadd.f32 %v4920_v48, %v4772_v63  ;;  %v921_v38 = vsel %vm801_vm10, %v4984_v45, %v897_v27  ;;  %v5095_v44 = vadd.f32 %v1218_v51, %v1217_v47 }
 0x143   : > { %v1263_v29 = vrot.slane %v1262_v56, 4  ;;  %v1255_v1 = vsel %vm1142_vm6, %v1134_v26, 0.0  ;;  %v920_v30 = vsel %vm800_vm11, %v4989_v53, %v896_v28  ;;  %v945_v24 = vmul.f32 1.050701, %v921_v38 }
 0x144   : > { %v1256_v34 = vrot.slane %v1255_v1, 4  ;;  %v944_v52 = vmul.f32 1.050701, %v920_v30  ;;  %v899_v48 = vmul.f32 1.6732632, %v3895_v3  ;;  %v5100_v25 = vadd.f32 %v4772_v63, %v4924_v55 }
 0x145   : > { %v1264_v13 = vadd.f32 %v1263_v29, %v1262_v56  ;;  %v852_v37 = vmul.f32 1.442695, %v5086_v54  ;;  %vm1343_vm13 = vcmask 1041409   ;;  %v5102_v16 = vadd.f32 %v1230_v18, %v1229_v46  ;;  %v1082_v46 = vpop.permute.xlu1 %1081 }
 0x146   : > { %v1257_v45 = vadd.f32 %v1256_v34, %v1255_v1  ;;  %v1113_v15 = vmul.f32 %v1072_v61, %v945_v24  ;;  %v1112_v19 = vmul.f32 %v1067_v36, %v944_v52  ;;  %v5104_v53 = vadd.f32 %v1242_v21, %v1241_v5 }
 0x147   : > { %v1265_v47 = vrot.slane %v1264_v13, 2  ;;  %v923_v17 = vsel %vm803_vm12, %v5006_v20, %v899_v48  ;;  %4399 = vpow2.f32 %v852_v37  ;;  %vm1345_vm14 = vcmask 1042434  }
 0x148   : > { %v1258_v51 = vrot.slane %v1257_v45, 2  ;;  %v1137_v31 = vmul.f32 %v1113_v15, %v5071_v6  ;;  %v1136_v63 = vmul.f32 %v1112_v19, %v5071_v6  ;;  %v947_v55 = vmul.f32 1.050701, %v923_v17 }
 0x149   : > { %vm802_vm15 = vcmp.gt.f32.partialorder %v5050_v43, 0.0  ;;  %vm1347_vm0 = vcmask 1043459   ;;  %v1266_v36 = vadd.f32 %v1265_v47, %v1264_v13  ;;  %v850_v5 = vmul.f32 1.442695, %v5100_v25 }
 0x14a   : > { %v1183_v18 = vrot.slane %v4947_v14, 1  ;;  %v1188_v21 = vrot.slane %v4997_v11, 2  ;;  %vm1349_vm1 = vcmask 1044484   ;;  %v1259_v20 = vadd.f32 %v1258_v51, %v1257_v45 }
 0x14b   : > { %v1276_v26 = vsel %vm1142_vm6, %v1137_v31, 0.0  ;;  %v1269_v27 = vsel %vm1142_vm6, %v1136_v63, 0.0  ;;  %v1115_v28 = vmul.f32 %v1082_v46, %v947_v55  ;;  %vm1351_vm2 = vcmask 1045509   ;;  %v4398_v29 = vpop.eup %4397 }
 0x14c   : > { %v1232_v3 = vrot.slane %v5102_v16, 1  ;;  %v1277_v56 = vrot.slane %v1276_v26, 4  ;;  %v1270_v61 = vrot.slane %v1269_v27, 4  ;;  %4401 = vpow2.f32 %v850_v5 }
 0x14d   : > { %v1267_v1 = vrot.slane %v1266_v36, 1  ;;  %v1260_v38 = vrot.slane %v1259_v20, 1  ;;  %v1139_v30 = vmul.f32 %v1115_v28, %v5071_v6  ;;  %v1189_v34 = vadd.f32 %v1188_v21, %v4997_v11 }
 0x14e   : > { %vm1353_vm3 = vcmask 1046534   ;;  %v1278_v24 = vadd.f32 %v1277_v56, %v1276_v26  ;;  %v1271_v52 = vadd.f32 %v1270_v61, %v1269_v27  ;;  %v3894_v13 = vadd.f32 -1.0, %v4398_v29 }
 0x14f   : > { %vm805_vm5 = vcmp.gt.f32.partialorder %v5086_v54, 0.0  ;;  %v1177_v48 = vadd.f32 %v1176_v57, %v4949_v4  ;;  %vm1355_vm7 = vcmask 1047559   ;;  %v1290_v37 = vsel %vm1142_vm6, %v1139_v30, 0.0 }
 0x150   : > { %v1184_v45 = vadd.f32 %v1183_v18, %v4947_v14  ;;  %v1190_v15 = vrot.slane %v1189_v34, 1  ;;  %v1194_v11 = vadd.f32 %v1193_v50, %v4974_v22  ;;  %v1279_v19 = vrot.slane %v1278_v24, 2 }
 0x151   : > { %v1272_v47 = vrot.slane %v1271_v52, 2  ;;  %v1291_v17 = vrot.slane %v1290_v37, 4  ;;  %v898_v51 = vmul.f32 1.6732632, %v3894_v13  ;;  %v1268_v31 = vadd.f32 %v1267_v1, %v1266_v36  ;;  %v4400_v57 = vpop.eup %4399 }
 0x152   : > { %v1261_v63 = vadd.f32 %v1260_v38, %v1259_v20  ;;  %v1195_v55 = vrot.slane %v1194_v11, 2  ;;  %v1344_v4 = vsel %vm1343_vm13, %v4914_v35, %v4917_v39  ;;  %v1280_v46 = vadd.f32 %v1279_v19, %v1278_v24  ;;  %v1077_v20 = vpop.permute.xlu0 %1076 }
 0x153   : > { %v1273_v5 = vadd.f32 %v1272_v47, %v1271_v52  ;;  %v1292_v14 = vadd.f32 %v1291_v17, %v1290_v37  ;;  %v922_v18 = vsel %vm802_vm15, %v5050_v43, %v898_v51  ;;  %vm804_vm8 = vcmp.gt.f32.partialorder %v5100_v25, 0.0  ;;  %v1092_v37 = vpop.permute.xlu1 %1091 }
 0x154   : > { %v946_v22 = vmul.f32 1.050701, %v922_v18  ;;  %v3897_v50 = vadd.f32 -1.0, %v4400_v57  ;;  %v1196_v21 = vadd.f32 %v1195_v55, %v1194_v11  ;;  %v1346_v36 = vsel %vm1345_vm14, %v4979_v49, %v1344_v4 }
 0x155   : > { %v1281_v26 = vrot.slane %v1280_v46, 1  ;;  %v1191_v27 = vadd.f32 %v1190_v15, %v1189_v34  ;;  %v1348_v35 = vsel %vm1347_vm0, %v4942_v41, %v1346_v36  ;;  %v1233_v39 = vadd.f32 %v1232_v3, %v5102_v16 }
 0x156   : > { %v1114_v28 = vmul.f32 %v1077_v20, %v946_v22  ;;  %v901_v56 = vmul.f32 1.6732632, %v3897_v50  ;;  %v1197_v61 = vrot.slane %v1196_v21, 1  ;;  %v1350_v43 = vsel %vm1349_vm1, %v1177_v48, %v1348_v35  ;;  %v4402_v29 = vpop.eup %4401 }
 0x157   : > { %v1282_v1 = vadd.f32 %v1281_v26, %v1280_v46  ;;  %v1274_v38 = vrot.slane %v1273_v5, 1  ;;  %v1293_v30 = vrot.slane %v1292_v14, 2  ;;  %v1352_v24 = vsel %vm1351_vm2, %v1184_v45, %v1350_v43 }
 0x158   : > { %v1138_v49 = vmul.f32 %v1114_v28, %v5071_v6  ;;  %v925_v34 = vsel %vm805_vm5, %v5086_v54, %v901_v56  ;;  %v3896_v41 = vadd.f32 -1.0, %v4402_v29  ;;  %v1198_v52 = vadd.f32 %v1197_v61, %v1196_v21 }
 0x159   : > { %v949_v16 = vmul.f32 1.050701, %v925_v34  ;;  %v1354_v3 = vsel %vm1353_vm3, %v1191_v27, %v1352_v24  ;;  %v1239_v13 = vrot.slane %v5081_v33, 1  ;;  %v1244_v48 = vrot.slane %v5104_v53, 2 }
 0x15a   : > { %v1283_v15 = vsel %vm1142_vm6, %v1138_v49, 0.0  ;;  %v900_v11 = vmul.f32 1.6732632, %v3896_v41  ;;  %v1356_v45 = vsel %vm1355_vm7, %v1198_v52, %v1354_v3  ;;  %v1250_v19 = vadd.f32 %v1249_v10, %v5053_v40 }
 0x15b   : > { %v1275_v54 = vadd.f32 %v1274_v38, %v1273_v5  ;;  %v1284_v47 = vrot.slane %v1283_v15, 4  ;;  %v1117_v17 = vmul.f32 %v1092_v37, %v949_v16  ;;  %4103 = vmatmul.mubr.msk.f32.vlgmr.msra.gmra.mrb[0].mxu1 %vm1142_vm6, %v1356_v45  ;;  %v1245_v51 = vadd.f32 %v1244_v48, %v5104_v53  ;;  %v1586_v48 = vld [vmem:[%s5556_s10] sm:$0xff]  ;;  %v1588_v37 = vld [vmem:[%s5556_s10 + $0x10] sm:$0xff] }
 0x15c   : > { %v1294_v55 = vadd.f32 %v1293_v30, %v1292_v14  ;;  %v924_v4 = vsel %vm804_vm8, %v5100_v25, %v900_v11  ;;  %4105 = vmatprep.mubr.msk.f32.mxu1 %vm4525_vm4, %v4526_v62  ;;  %v1251_v57 = vrot.slane %v1250_v19, 2  ;;  %v1357_v40 = vsel %vm1343_vm13, %v5062_v32, %v5067_v2  ;;  %4283 = vmatpush3.bf16.msra.mxu1 %v4282_v9  ;;  %v1087_v25 = vpop.permute.xlu0 %1086  ;;  %v1589_v11 = vld [vmem:[%s5556_s10 + $0x18] sm:$0xff] }
 0x15d   : > { %v1285_v10 = vadd.f32 %v1284_v47, %v1283_v15  ;;  %v1141_v53 = vmul.f32 %v1117_v17, %v5071_v6  ;;  %v948_v46 = vmul.f32 1.050701, %v924_v4  ;;  %v1246_v5 = vrot.slane %v1245_v51, 1  ;;  %4284 = vmatprep.subr.bf16.mxu1 %v4524_v58 }
 0x15e   : > { %v1240_v14 = vadd.f32 %v1239_v13, %v5081_v33  ;;  %v1252_v18 = vadd.f32 %v1251_v57, %v1250_v19  ;;  %v1358_v22 = vsel %vm1345_vm14, %v5095_v44, %v1357_v40  ;;  %v1364_v32 = vsel %vm1343_vm13, %v1268_v31, %v1261_v63  ;;  %v3904_v57 = vld [vmem:[%s5555_s9] ss:$0 sm:$0xff] }
 0x15f   : > { %v1286_v2 = vrot.slane %v1285_v10, 2  ;;  %v1304_v59 = vsel %vm1142_vm6, %v1141_v53, 0.0  ;;  %v1116_v60 = vmul.f32 %v1087_v25, %v948_v46  ;;  %v1247_v9 = vadd.f32 %v1246_v5, %v1245_v51 }
 0x160   : > { %v1305_v50 = vrot.slane %v1304_v59, 4  ;;  %v1253_v21 = vrot.slane %v1252_v18, 1  ;;  %v1359_v36 = vsel %vm1347_vm0, %v5076_v12, %v1358_v22  ;;  %v1365_v20 = vsel %vm1345_vm14, %v1275_v54, %v1364_v32  ;;  %4286 = vmatpush3.bf16.msra.mxu1 %v4285_v23 }
 0x161   : > { %v1287_v33 = vadd.f32 %v1286_v2, %v1285_v10  ;;  %v1140_v44 = vmul.f32 %v1116_v60, %v5071_v6  ;;  %v1360_v31 = vsel %vm1349_vm1, %v1233_v39, %v1359_v36  ;;  %v1366_v63 = vsel %vm1347_vm0, %v1282_v1, %v1365_v20  ;;  %4287 = vmatprep.subr.bf16.mxu1 %v4524_v58 }
 0x162   : > { %v1254_v26 = vadd.f32 %v1253_v21, %v1252_v18  ;;  %v1361_v27 = vsel %vm1351_vm2, %v1240_v14, %v1360_v31  ;;  %v1295_v35 = vrot.slane %v1294_v55, 1  ;;  %v1306_v12 = vadd.f32 %v1305_v50, %v1304_v59 }
 0x163   : > { %v1288_v28 = vrot.slane %v1287_v33, 1  ;;  %v1297_v56 = vsel %vm1142_vm6, %v1140_v44, 0.0  ;;  %v1362_v8 = vsel %vm1353_vm3, %v1247_v9, %v1361_v27  ;;  %v4291_v45 = vpack.c.bf16 %v1589_v11, %v1588_v37 }
 0x164   : > { %v1298_v7 = vrot.slane %v1297_v56, 4  ;;  %v1363_v23 = vsel %vm1355_vm7, %v1254_v26, %v1362_v8  ;;  %v1307_v61 = vrot.slane %v1306_v12, 2  ;;  %v1296_v29 = vadd.f32 %v1295_v35, %v1294_v55 }
 0x165   : > { %4106 = vmatmul.mubr.msk.f32.gmra.mrb[2].mxu1 %vm1142_vm6, %v1363_v23  ;;  %v1289_v39 = vadd.f32 %v1288_v28, %v1287_v33  ;;  %v1577_v33 = vld [vmem:[%s466_s15] sm:$0xff]  ;;  %vm1685_vm12 = vcmask 64512   ;;  %vm3703_vm13 = vcmask 195584  }
 0x166   : > { %v1299_v43 = vadd.f32 %v1298_v7, %v1297_v56  ;;  %4108 = vmatprep.mubr.msk.f32.mxu1 %vm4525_vm4, %v4526_v62  ;;  %v1308_v1 = vadd.f32 %v1307_v61, %v1306_v12  ;;  %v1578_v12 = vld [vmem:[%s466_s15 + $0x8] sm:$0xff]  ;;  %v4457_v56 = vld [vmem:[%s4807_s30] sm:$0xff]  ;;  %s4527_s30 = smov 96  }
 0x167   : > { %v1367_v38 = vsel %vm1349_vm1, %v1289_v39, %v1366_v63 }
 0x168   : > { %v1300_v30 = vrot.slane %v1299_v43, 2  ;;  %v1368_v24 = vsel %vm1351_vm2, %v1296_v29, %v1367_v38  ;;  %v1309_v34 = vrot.slane %v1308_v1, 1 }
 0x16a   : > { %v1301_v49 = vadd.f32 %v1300_v30, %v1299_v43  ;;  %v1310_v16 = vadd.f32 %v1309_v34, %v1308_v1  ;;  %v1579_v43 = vld [vmem:[%s466_s15 + $0x10] sm:$0xff]  ;;  %s4533_s15 = smov 112  }
 0x16c   : > { %v1302_v41 = vrot.slane %v1301_v49, 1 }
 0x16e   : > { %v1303_v52 = vadd.f32 %v1302_v41, %v1301_v49 }
 0x170   : > { %v1369_v3 = vsel %vm1353_vm3, %v1303_v52, %v1368_v24 }
 0x171   : > { %v1370_v13 = vsel %vm1355_vm7, %v1310_v16, %v1369_v3 }
 0x172   : > { %4109 = vmatmul.mubr.msk.f32.gmra.mrb[4].mxu1 %vm1142_vm6, %v1370_v13  ;;  %v5284_v13 = vld [vmem:[%s479_s29] sm:$0xff] }
 0x173   : > { %4119 = vmatprep.mubr.msk.f32.mxu1 %vm4525_vm4, %v4526_v62 }
 0x176   : > { %4120 = vmatmul.mubr.msk.f32.vlgmr.msra.gmra.mrb[6].mxu1 %vm1142_vm6, %v4819_v42  ;;  %v1587_v42 = vld [vmem:[%s5556_s10 + $0x8] sm:$0xff] }
 0x177   : > { %4122 = vmatprep.mubr.msk.f32.mxu1 %vm4525_vm4, %v4526_v62  ;;  %v4288_v15 = vpack.c.bf16 %v1587_v42, %v1586_v48 }
 0x179   : > { %4289 = vmatpush3.bf16.msra.mxu1 %v4288_v15  ;;  %v5287_v15 = vld [vmem:[%s479_s29 + $0x8] sm:$0xff] }
 0x17a   : > { %4123 = vmatmul.mubr.msk.f32.gmra.mrb[8].mxu1 %vm1142_vm6, %v4927_v0  ;;  %4290 = vmatprep.subr.bf16.mxu1 %v4524_v58 }
 0x17b   : > { %4125 = vmatprep.mubr.msk.f32.mxu1 %vm4525_vm4, %v4526_v62 }
 0x17d   : > { %4292 = vmatpush3.bf16.msra.mxu1 %v4291_v45 }
 0x17e   : > { %4126 = vmatmul.mubr.msk.f32.gmra.mrb[10].mxu1 %vm1142_vm6, %v5071_v6  ;;  %4145 = vmatprep.subr.mxu1 %v4526_v62 }
 0x17f   : > { %4136 = vmatprep.mubr.msk.f32.mxu1 %vm4525_vm4, %v4526_v62 }
 0x22e   : > { %v1443_v19 = vpop.f32.mrb[0].mxu1 }
 0x22f   : > { %v4104_v54 = vpop.f32.mrb[1].mxu1 }
 0x238   : > { %v1448_v47 = vpop.f32.mrb[2].mxu1 }
 0x239   : > { %v4107_v17 = vpop.f32.mrb[3].mxu1 }
 0x245   : > { %v1453_v51 = vpop.f32.mrb[4].mxu1 }
 0x246   : > { %v4110_v55 = vpop.f32.mrb[5].mxu1 }
 0x249   : > { %v1532_v4 = vpop.f32.mrb[6].mxu1 }
 0x24a   : > { %v1533_v40 = vadd.f32 %v1532_v4, %v1443_v19  ;;  %v4121_v10 = vpop.f32.mrb[7].mxu1 }
 0x24c   : > { %v1553_v53 = vadd.f32 %v3904_v57, %v1533_v40 }
 0x24d   : > { %v1537_v46 = vpop.f32.mrb[8].mxu1 }
 0x24e   : > { %v1559_v58 = vmul.f32 1.442695, %v1553_v53  ;;  %v1538_v5 = vadd.f32 %v1537_v46, %v1448_v47  ;;  %v4124_v25 = vpop.f32.mrb[9].mxu1  ;;  %vm1556_vm9 = vcmp.gt.f32.partialorder %v1553_v53, 0.0  ;;  %v5291_v47 = vld [vmem:[%s479_s29 + $0x10] sm:$0xff]  ;;  %s4537_s29 = smov 40  }
 0x250   : > { %4403 = vpow2.f32 %v1559_v58  ;;  %v1554_v14 = vadd.f32 %v3904_v57, %v1538_v5 }
 0x251   : > { %v1542_v18 = vpop.f32.mrb[10].mxu1 }
 0x252   : > { %v1561_v22 = vmul.f32 1.442695, %v1554_v14  ;;  %v1543_v32 = vadd.f32 %v1542_v18, %v1453_v51  ;;  %v4127_v2 = vpop.f32.mrb[11].mxu1  ;;  %vm1557_vm10 = vcmp.gt.f32.partialorder %v1554_v14, 0.0 }
 0x254   : > { %4405 = vpow2.f32 %v1561_v22  ;;  %v1555_v59 = vadd.f32 %v3904_v57, %v1543_v32 }
 0x256   : > { %v1563_v60 = vmul.f32 1.442695, %v1555_v59  ;;  %vm1558_vm11 = vcmp.gt.f32.partialorder %v1555_v59, 0.0 }
 0x258   : > { %4407 = vpow2.f32 %v1563_v60 }
 0x25a   : > { %v4404_v9 = vpop.eup %4403 }
 0x25b   : > { %v3905_v50 = vadd.f32 -1.0, %v4404_v9 }
 0x25d   : > { %v1568_v21 = vmul.f32 1.6732632, %v3905_v50 }
 0x25e   : > { %v4406_v36 = vpop.eup %4405 }
 0x25f   : > { %v1571_v20 = vsel %vm1556_vm9, %v1553_v53, %v1568_v21  ;;  %v3906_v44 = vadd.f32 -1.0, %v4406_v36 }
 0x260   : > { %v1574_v31 = vmul.f32 1.050701, %v1571_v20 }
 0x261   : > { %v1569_v63 = vmul.f32 1.6732632, %v3906_v44 }
 0x262   : > { %v4408_v26 = vpop.eup %4407  ;;  %v1580_v27 = vmul.f32 %v1577_v33, %v1574_v31 }
 0x263   : > { %v1572_v35 = vsel %vm1557_vm10, %v1554_v14, %v1569_v63  ;;  %v3907_v28 = vadd.f32 -1.0, %v4408_v26 }
 0x264   : > { %v5233_v8 = vadd.f32 %v4457_v56, %v1580_v27  ;;  %v1575_v7 = vmul.f32 1.050701, %v1572_v35 }
 0x265   : > { %v1570_v23 = vmul.f32 1.6732632, %v3907_v28 }
 0x266   : > { %v1581_v61 = vmul.f32 %v1578_v12, %v1575_v7  ;;  %4137 = vmatmul.mubr.msk.f32.vlgmr.msra.gmra.mrb[12].mxu1 %vm1142_vm6, %v5233_v8 }
 0x267   : > { %v1573_v39 = vsel %vm1558_vm11, %v1555_v59, %v1570_v23  ;;  %4139 = vmatprep.mubr.msk.f32.mxu1 %vm4525_vm4, %v4526_v62 }
 0x268   : > { %v1576_v29 = vmul.f32 1.050701, %v1573_v39  ;;  %v5240_v1 = vadd.f32 %v1581_v61, %v4927_v0 }
 0x26a   : > { %v1582_v38 = vmul.f32 %v1579_v43, %v1576_v29  ;;  %4140 = vmatmul.mubr.msk.f32.gmra.mrb[14].mxu1 %vm1142_vm6, %v5240_v1 }
 0x26b   : > { %4142 = vmatprep.mubr.msk.f32.mxu1 %vm4525_vm4, %v4526_v62 }
 0x26c   : > { %v5247_v30 = vadd.f32 %v1582_v38, %v5071_v6 }
 0x26e   : > { %4143 = vmatmul.mubr.msk.f32.gmra.mrb[16].mxu1 %vm1142_vm6, %v5247_v30 }
 0x26f   : > { %4147 = vmatprep.mubr.msk.f32.mxu1 %vm4525_vm4, %v4526_v62 }
 0x339   : > { %v5253_v24 = vpop.f32.mrb[12].mxu1 }
 0x33a   : > { %1683 = vrot.lane.b32.xlu0 %v5253_v24, %s4527_s30  ;;  %v4138_v0 = vpop.f32.mrb[13].mxu1 }
 0x33d   : > { %v5256_v49 = vpop.f32.mrb[14].mxu1 }
 0x33e   : > { %1761 = vrot.lane.b32.xlu1 %v5256_v49, %s4527_s30  ;;  %v4141_v34 = vpop.f32.mrb[15].mxu1 }
 0x341   : > { %v5259_v41 = vpop.f32.mrb[16].mxu1 }
 0x342   : > { %1838 = vrot.lane.b32.xlu0 %v5259_v41, %s4527_s30  ;;  %v4144_v6 = vpop.f32.mrb[17].mxu1  ;;  %s4534_s30 = smov 48  }
 0x3ac   : > { %v1684_v52 = vpop.permute.xlu0 %1683 }
 0x3ad   : > { %4146 = vmatpush3.xpose.msk.msra.mxu1 %vm1685_vm12, %v1684_v52 }
 0x3ae   : > { %4150 = vmatprep.subr.mxu1 %v4526_v62 }
 0x3b0   : > { %4148 = vmatmul.mubr.msk.f32.vlgmr.msra.gmra.mrb[18].mxu1 %vm1685_vm12, %v5253_v24  ;;  %v1762_v16 = vpop.permute.xlu1 %1761 }
 0x3b1   : > { %4151 = vmatpush3.xpose.msk.msra.mxu1 %vm1685_vm12, %v1762_v16  ;;  %4152 = vmatprep.mubr.msk.f32.mxu1 %vm4525_vm4, %v4526_v62 }
 0x3b2   : > { %4155 = vmatprep.subr.mxu1 %v4526_v62 }
 0x3b4   : > { %4153 = vmatmul.mubr.msk.f32.vlgmr.msra.gmra.mrb[20].mxu1 %vm1685_vm12, %v5256_v49  ;;  %v1839_v3 = vpop.permute.xlu0 %1838 }
 0x3b5   : > { %4156 = vmatpush3.xpose.msk.msra.mxu1 %vm1685_vm12, %v1839_v3  ;;  %4157 = vmatprep.mubr.msk.f32.mxu1 %vm4525_vm4, %v4526_v62 }
 0x3b6   : > { %4165 = vmatprep.subr.mxu1 %v4526_v62 }
 0x3b8   : > { %4158 = vmatmul.mubr.msk.f32.vlgmr.msra.gmra.mrb[22].mxu1 %vm1685_vm12, %v5259_v41 }
 0x3b9   : > { %4167 = vmatprep.mubr.msk.f32.mxu1 %vm4525_vm4, %v4526_v62 }
 0x483   : > { %v1756_v48 = vpop.f32.mrb[18].mxu1 }
 0x484   : > { %v1757_v42 = vadd.f32 %v1756_v48, %v5284_v13  ;;  %v4149_v37 = vpop.f32.mrb[19].mxu1 }
 0x486   : > { %v1914_v11 = vsel %vm1685_vm12, %v1757_v42, -inf }
 0x487   : > { %1915 = vmax.xlane.f32.xlu1 %v1914_v11  ;;  %v1833_v45 = vpop.f32.mrb[20].mxu1 }
 0x488   : > { %v1834_v19 = vadd.f32 %v1833_v45, %v5287_v15  ;;  %v4154_v54 = vpop.f32.mrb[21].mxu1 }
 0x48a   : > { %v1917_v17 = vsel %vm1685_vm12, %v1834_v19, -inf }
 0x48b   : > { %1918 = vmax.xlane.f32.xlu0 %v1917_v17  ;;  %v1910_v51 = vpop.f32.mrb[22].mxu1 }
 0x48c   : > { %v1911_v55 = vadd.f32 %v1910_v51, %v5291_v47  ;;  %v4159_v4 = vpop.f32.mrb[23].mxu1 }
 0x48e   : > { %v1920_v57 = vsel %vm1685_vm12, %v1911_v55, -inf }
 0x48f   : > { %1921 = vmax.xlane.f32.xlu0 %v1920_v57 }
 0x498   : > { %1947 = vrot.lane.b32.xlu1 %v5253_v24, %s4528_s24 }
 0x49c   : > { %2099 = vrot.lane.b32.xlu1 %v5259_v41, %s4528_s24 }
 0x4a0   : > { %2175 = vrot.lane.b32.xlu1 %v5253_v24, %s4529_s16 }
 0x4a5   : > { %2023 = vrot.lane.b32.xlu0 %v5256_v49, %s4528_s24  ;;  %s5558_s24 = smov 8  }
 0x4a9   : > { %2177 = vrot.lane.b32.xlu0 %v5253_v24, %s4530_s12 }
 0x514   : > { %v1916_v40 = vpop.xlane.xlu1 %1915 }
 0x515   : > { %v1923_v10 = vsub.f32 %v1757_v42, %v1916_v40 }
 0x517   : > { %v1926_v53 = vmul.f32 1.442695, %v1923_v10 }
 0x518   : > { %v1948_v46 = vpop.permute.xlu1 %1947  ;;  %v1919_v58 = vpop.xlane.xlu0 %1918 }
 0x519   : > { %4409 = vpow2.f32 %v1926_v53  ;;  %v1924_v5 = vsub.f32 %v1834_v19, %v1919_v58  ;;  %4161 = vmatpush3.msra.mxu0 %v1948_v46 }
 0x51a   : > { %4170 = vmatprep.subr.mxu0 %v4526_v62 }
 0x51b   : > { %v1928_v25 = vmul.f32 1.442695, %v1924_v5 }
 0x51c   : > { %v1922_v14 = vpop.xlane.xlu0 %1921  ;;  %v2100_v36 = vpop.permute.xlu1 %2099 }
 0x51d   : > { %4411 = vpow2.f32 %v1928_v25  ;;  %v1925_v60 = vsub.f32 %v1911_v55, %v1922_v14 }
 0x51f   : > { %v1930_v9 = vmul.f32 1.442695, %v1925_v60 }
 0x520   : > { %v2024_v18 = vpop.permute.xlu0 %2023  ;;  %v2176_v20 = vpop.permute.xlu1 %2175 }
 0x521   : > { %4166 = vmatpush3.msra.mxu1 %v2024_v18  ;;  %4413 = vpow2.f32 %v1930_v9 }
 0x522   : > { %4175 = vmatprep.subr.mxu1 %v4526_v62 }
 0x523   : > { %v4410_v22 = vpop.eup %4409 }
 0x524   : > { %v1932_v32 = vsel %vm1685_vm12, %v4410_v22, 0.0  ;;  %v2178_v33 = vpop.permute.xlu0 %2177 }
 0x525   : > { %1933 = vadd.xlane.f32.xlu1 %v1932_v32 }
 0x527   : > { %v4412_v2 = vpop.eup %4411 }
 0x528   : > { %v1935_v59 = vsel %vm1685_vm12, %v4412_v2, 0.0 }
 0x529   : > { %1936 = vadd.xlane.f32.xlu0 %v1935_v59 }
 0x52b   : > { %v4414_v50 = vpop.eup %4413 }
 0x52c   : > { %v1938_v21 = vsel %vm1685_vm12, %v4414_v50, 0.0 }
 0x536   : > { %2333 = vrot.lane.b32.xlu1 %v5259_v41, %s4530_s12 }
 0x53f   : > { %2255 = vrot.lane.b32.xlu0 %v5256_v49, %s4530_s12  ;;  %s4540_s12 = smov 24  }
 0x543   : > { %2253 = vrot.lane.b32.xlu0 %v5256_v49, %s4529_s16 }
 0x55a   : > { %1939 = vadd.xlane.f32.xlu1 %v1938_v21 }
 0x56b   : > { %2331 = vrot.lane.b32.xlu1 %v5259_v41, %s4529_s16  ;;  %s4539_s16 = smov 16  }
 0x5b2   : > { %v1934_v44 = vpop.xlane.xlu1 %1933 }
 0x5b3   : > { %4415 = vrcp.f32 %v1934_v44 }
 0x5b6   : > { %v1937_v31 = vpop.xlane.xlu0 %1936  ;;  %v2334_v12 = vpop.permute.xlu1 %2333 }
 0x5b7   : > { %4417 = vrcp.f32 %v1937_v31 }
 0x5ba   : > { %v2256_v23 = vpop.permute.xlu0 %2255 }
 0x5bd   : > { %v4416_v63 = vpop.eup %4415 }
 0x5be   : > { %v1944_v26 = vmul.f32 %v4416_v63, %v4410_v22  ;;  %v2254_v39 = vpop.permute.xlu0 %2253 }
 0x5c0   : > { %4163 = vmatmul.mubr.msk.f32.vlgmr.msra.gmra.mrb[24].mxu0 %vm1685_vm12, %v1944_v26 }
 0x5c1   : > { %v4418_v27 = vpop.eup %4417  ;;  %4171 = vmatpush3.msra.mxu0 %v2100_v36  ;;  %4172 = vmatprep.mubr.msk.f32.mxu0 %vm4525_vm4, %v4526_v62 }
 0x5c2   : > { %v1945_v35 = vmul.f32 %v4418_v27, %v4412_v2  ;;  %4180 = vmatprep.subr.mxu0 %v4526_v62 }
 0x5c4   : > { %4168 = vmatmul.mubr.msk.f32.vlgmr.msra.gmra.mrb[24].mxu1 %vm1685_vm12, %v1945_v35 }
 0x5c5   : > { %4176 = vmatpush3.xpose.msk.msra.mxu1 %vm1685_vm12, %v2178_v33  ;;  %4177 = vmatprep.mubr.msk.f32.mxu1 %vm4525_vm4, %v4526_v62 }
 0x5c6   : > { %4185 = vmatprep.subr.mxu1 %v4526_v62 }
 0x5c8   : > { %4178 = vmatmul.mubr.msk.f32.vlgmr.msra.gmra.mrb[26].mxu1 %vm1685_vm12, %v2176_v20 }
 0x5c9   : > { %4186 = vmatpush3.xpose.msk.msra.mxu1 %vm1685_vm12, %v2334_v12  ;;  %4187 = vmatprep.mubr.msk.f32.mxu1 %vm4525_vm4, %v4526_v62 }
 0x5ca   : > { %4195 = vmatprep.subr.mxu1 %v4526_v62 }
 0x5e7   : > { %v1940_v28 = vpop.xlane.xlu1 %1939 }
 0x5e8   : > { %4419 = vrcp.f32 %v1940_v28 }
 0x5eb   : > { %v2332_v56 = vpop.permute.xlu1 %2331 }
 0x5ec   : > { %4188 = vmatmul.mubr.msk.f32.vlgmr.msra.gmra.mrb[28].mxu1 %vm1685_vm12, %v2332_v56 }
 0x5ed   : > { %4197 = vmatprep.mubr.msk.f32.mxu1 %vm4525_vm4, %v4526_v62 }
 0x5f2   : > { %v4420_v7 = vpop.eup %4419 }
 0x5f3   : > { %v1946_v61 = vmul.f32 %v4420_v7, %v4414_v50 }
 0x5f5   : > { %4173 = vmatmul.mubr.msk.f32.vlgmr.msra.gmra.mrb[26].mxu0 %vm1685_vm12, %v1946_v61 }
 0x5f6   : > { %4181 = vmatpush3.xpose.msk.msra.mxu0 %vm1685_vm12, %v2256_v23  ;;  %4182 = vmatprep.mubr.msk.f32.mxu0 %vm4525_vm4, %v4526_v62 }
 0x5f7   : > { %4190 = vmatprep.subr.mxu0 %v4526_v62 }
 0x5f9   : > { %4183 = vmatmul.mubr.msk.f32.vlgmr.msra.gmra.mrb[28].mxu0 %vm1685_vm12, %v2254_v39 }
 0x5fa   : > { %4192 = vmatprep.mubr.msk.f32.mxu0 %vm4525_vm4, %v4526_v62 }
 0x693   : > { %v5338_v43 = vpop.f32.mrb[24].mxu0 }
 0x694   : > { %v4164_v29 = vpop.f32.mrb[25].mxu0 }
 0x697   : > { %v5340_v38 = vpop.f32.mrb[24].mxu1 }
 0x698   : > { %v4169_v0 = vpop.f32.mrb[25].mxu1 }
 0x69b   : > { %v2249_v34 = vpop.f32.mrb[26].mxu1 }
 0x69c   : > { %v2250_v6 = vadd.f32 %v2249_v34, %v5284_v13  ;;  %v4179_v52 = vpop.f32.mrb[27].mxu1 }
 0x69e   : > { %v2409_v16 = vsel %vm1685_vm12, %v2250_v6, -inf }
 0x69f   : > { %2410 = vmax.xlane.f32.xlu0 %v2409_v16 }
 0x6bf   : > { %v2405_v3 = vpop.f32.mrb[28].mxu1 }
 0x6c0   : > { %v2406_v48 = vadd.f32 %v2405_v3, %v5291_v47  ;;  %v4189_v42 = vpop.f32.mrb[29].mxu1 }
 0x6c2   : > { %v2415_v37 = vsel %vm1685_vm12, %v2406_v48, -inf }
 0x6c3   : > { %2416 = vmax.xlane.f32.xlu0 %v2415_v37 }
 0x6c8   : > { %v5346_v11 = vpop.f32.mrb[26].mxu0 }
 0x6c9   : > { %v4174_v45 = vpop.f32.mrb[27].mxu0 }
 0x6cc   : > { %v2327_v19 = vpop.f32.mrb[28].mxu0 }
 0x6cd   : > { %v2328_v54 = vadd.f32 %v2327_v19, %v5287_v15  ;;  %v4184_v17 = vpop.f32.mrb[29].mxu0 }
 0x6cf   : > { %v2412_v51 = vsel %vm1685_vm12, %v2328_v54, -inf }
 0x6d0   : > { %2413 = vmax.xlane.f32.xlu1 %v2412_v51 }
 0x6d9   : > { %2518 = vrot.lane.b32.xlu0 %v5256_v49, %s4531_s13 }
 0x6e1   : > { %2442 = vrot.lane.b32.xlu1 %v5253_v24, %s4531_s13 }
 0x6e5   : > { %2594 = vrot.lane.b32.xlu1 %v5259_v41, %s4531_s13  ;;  %s446_s13 = sand.u32 1, %s4512_s18  }
 0x6e9   : > { %2672 = vrot.lane.b32.xlu1 %v5253_v24, %s4532_s14 }
 0x6ed   : > { %2670 = vrot.lane.b32.xlu1 %v5253_v24, %s4533_s15 }
 0x72c   : > { %v2411_v55 = vpop.xlane.xlu0 %2410 }
 0x72d   : > { %v2418_v4 = vsub.f32 %v2250_v6, %v2411_v55 }
 0x72f   : > { %v2421_v57 = vmul.f32 1.442695, %v2418_v4 }
 0x731   : > { %4421 = vpow2.f32 %v2421_v57 }
 0x73b   : > { %v4422_v40 = vpop.eup %4421 }
 0x73c   : > { %v2427_v10 = vsel %vm1685_vm12, %v4422_v40, 0.0 }
 0x73d   : > { %2428 = vadd.xlane.f32.xlu0 %v2427_v10 }
 0x750   : > { %v2417_v53 = vpop.xlane.xlu0 %2416 }
 0x751   : > { %v2420_v58 = vsub.f32 %v2406_v48, %v2417_v53 }
 0x753   : > { %2750 = vrot.lane.b32.xlu0 %v5256_v49, %s4532_s14  ;;  %v2425_v14 = vmul.f32 1.442695, %v2420_v58 }
 0x754   : > { %v2519_v46 = vpop.permute.xlu0 %2518 }
 0x755   : > { %4196 = vmatpush3.msra.mxu1 %v2519_v46 }
 0x756   : > { %4205 = vmatprep.subr.mxu1 %v4526_v62 }
 0x75d   : > { %v2414_v5 = vpop.xlane.xlu1 %2413 }
 0x75e   : > { %v2419_v25 = vsub.f32 %v2328_v54, %v2414_v5 }
 0x760   : > { %v2423_v18 = vmul.f32 1.442695, %v2419_v25 }
 0x761   : > { %v2443_v22 = vpop.permute.xlu1 %2442 }
 0x762   : > { %4423 = vpow2.f32 %v2423_v18  ;;  %4191 = vmatpush3.msra.mxu0 %v2443_v22 }
 0x763   : > { %4200 = vmatprep.subr.mxu0 %v4526_v62  ;;  %4425 = vpow2.f32 %v2425_v14 }
 0x765   : > { %v2595_v36 = vpop.permute.xlu1 %2594 }
 0x769   : > { %v2673_v20 = vpop.permute.xlu1 %2672 }
 0x76c   : > { %v4424_v32 = vpop.eup %4423 }
 0x76d   : > { %v2430_v2 = vsel %vm1685_vm12, %v4424_v32, 0.0  ;;  %v4426_v59 = vpop.eup %4425  ;;  %v2671_v33 = vpop.permute.xlu1 %2670 }
 0x76e   : > { %2431 = vadd.xlane.f32.xlu1 %v2430_v2  ;;  %v2433_v60 = vsel %vm1685_vm12, %v4426_v59, 0.0 }
 0x772   : > { %2434 = vadd.xlane.f32.xlu0 %v2433_v60 }
 0x77f   : > { %2828 = vrot.lane.b32.xlu1 %v5259_v41, %s4532_s14  ;;  %s4293_s14 = smul.u32 24, %s446_s13 }
 0x788   : > { %2748 = vrot.lane.b32.xlu0 %v5256_v49, %s4533_s15 }
 0x78c   : > { %2826 = vrot.lane.b32.xlu0 %v5259_v41, %s4533_s15  ;;  %s448_s15 = scalar_lea.vmem [#allocation2], %s4293_s14  ;;  %s4541_s14 = smov [#allocation2]  }
 0x7ca   : > { %v2429_v9 = vpop.xlane.xlu0 %2428 }
 0x7cb   : > { %4427 = vrcp.f32 %v2429_v9 }
 0x7ce   : > { %v2751_v44 = vpop.permute.xlu0 %2750 }
 0x7d5   : > { %v4428_v50 = vpop.eup %4427 }
 0x7d6   : > { %v2439_v21 = vmul.f32 %v4428_v50, %v4422_v40 }
 0x7d8   : > { %4193 = vmatmul.mubr.msk.f32.vlgmr.msra.gmra.mrb[30].mxu0 %vm1685_vm12, %v2439_v21 }
 0x7d9   : > { %4201 = vmatpush3.msra.mxu0 %v2595_v36  ;;  %4202 = vmatprep.mubr.msk.f32.mxu0 %vm4525_vm4, %v4526_v62 }
 0x7da   : > { %4210 = vmatprep.subr.mxu0 %v4526_v62 }
 0x7fb   : > { %v2432_v31 = vpop.xlane.xlu1 %2431 }
 0x7fc   : > { %4429 = vrcp.f32 %v2432_v31 }
 0x7ff   : > { %v2435_v63 = vpop.xlane.xlu0 %2434  ;;  %v2829_v56 = vpop.permute.xlu1 %2828 }
 0x800   : > { %4431 = vrcp.f32 %v2435_v63 }
 0x803   : > { %v2749_v12 = vpop.permute.xlu0 %2748 }
 0x806   : > { %v4430_v26 = vpop.eup %4429 }
 0x807   : > { %v2440_v27 = vmul.f32 %v4430_v26, %v4424_v32  ;;  %v2827_v7 = vpop.permute.xlu0 %2826 }
 0x809   : > { %4198 = vmatmul.mubr.msk.f32.vlgmr.msra.gmra.mrb[30].mxu1 %vm1685_vm12, %v2440_v27 }
 0x80a   : > { %v4432_v35 = vpop.eup %4431  ;;  %4206 = vmatpush3.xpose.msk.msra.mxu1 %vm1685_vm12, %v2673_v20  ;;  %4207 = vmatprep.mubr.msk.f32.mxu1 %vm4525_vm4, %v4526_v62 }
 0x80b   : > { %v2441_v28 = vmul.f32 %v4432_v35, %v4426_v59  ;;  %4215 = vmatprep.subr.mxu1 %v4526_v62 }
 0x80d   : > { %4203 = vmatmul.mubr.msk.f32.vlgmr.msra.gmra.mrb[32].mxu0 %vm1685_vm12, %v2441_v28  ;;  %4208 = vmatmul.mubr.msk.f32.vlgmr.msra.gmra.mrb[32].mxu1 %vm1685_vm12, %v2671_v33 }
 0x80e   : > { %4211 = vmatpush3.xpose.msk.msra.mxu0 %vm1685_vm12, %v2751_v44  ;;  %4216 = vmatpush3.xpose.msk.msra.mxu1 %vm1685_vm12, %v2829_v56 }
 0x80f   : > { %4212 = vmatprep.mubr.msk.f32.mxu0 %vm4525_vm4, %v4526_v62  ;;  %4217 = vmatprep.mubr.msk.f32.mxu1 %vm4525_vm4, %v4526_v62 }
 0x810   : > { %4220 = vmatprep.subr.mxu0 %v4526_v62  ;;  %4225 = vmatprep.subr.mxu1 %v4526_v62 }
 0x811   : > { %4213 = vmatmul.mubr.msk.f32.vlgmr.msra.gmra.mrb[34].mxu0 %vm1685_vm12, %v2749_v12  ;;  %4218 = vmatmul.mubr.msk.f32.vlgmr.msra.gmra.mrb[34].mxu1 %vm1685_vm12, %v2827_v7 }
 0x812   : > { %4222 = vmatprep.mubr.msk.f32.mxu0 %vm4525_vm4, %v4526_v62  ;;  %4227 = vmatprep.mubr.msk.f32.mxu1 %vm4525_vm4, %v4526_v62 }
 0x8ab   : > { %v5395_v23 = vpop.f32.mrb[30].mxu0 }
 0x8ac   : > { %v4194_v61 = vpop.f32.mrb[31].mxu0 }
 0x8dc   : > { %v5397_v39 = vpop.f32.mrb[30].mxu1 }
 0x8dd   : > { %v4199_v29 = vpop.f32.mrb[31].mxu1 }
 0x8e0   : > { %v5399_v0 = vpop.f32.mrb[32].mxu0  ;;  %v2744_v34 = vpop.f32.mrb[32].mxu1 }
 0x8e1   : > { %v2745_v6 = vadd.f32 %v2744_v34, %v5284_v13  ;;  %v4204_v52 = vpop.f32.mrb[33].mxu0  ;;  %v4209_v16 = vpop.f32.mrb[33].mxu1 }
 0x8e3   : > { %v2904_v3 = vsel %vm1685_vm12, %v2745_v6, -inf }
 0x8e4   : > { %v2822_v48 = vpop.f32.mrb[34].mxu0  ;;  %2905 = vmax.xlane.f32.xlu1 %v2904_v3  ;;  %v2900_v42 = vpop.f32.mrb[34].mxu1 }
 0x8e5   : > { %v2823_v37 = vadd.f32 %v2822_v48, %v5287_v15  ;;  %v4214_v45 = vpop.f32.mrb[35].mxu0  ;;  %v4219_v19 = vpop.f32.mrb[35].mxu1  ;;  %v2901_v54 = vadd.f32 %v2900_v42, %v5291_v47 }
 0x8e7   : > { %v2907_v17 = vsel %vm1685_vm12, %v2823_v37, -inf  ;;  %v2910_v51 = vsel %vm1685_vm12, %v2901_v54, -inf }
 0x8e8   : > { %2908 = vmax.xlane.f32.xlu0 %v2907_v17 }
 0x8ec   : > { %2911 = vmax.xlane.f32.xlu0 %v2910_v51 }
 0x8f5   : > { %2937 = vrot.lane.b32.xlu1 %v5253_v24, %s4534_s30 }
 0x8f9   : > { %3089 = vrot.lane.b32.xlu1 %v5259_v41, %s4534_s30 }
 0x8fd   : > { %3165 = vrot.lane.b32.xlu1 %v5253_v24, %s4535_s22 }
 0x902   : > { %3013 = vrot.lane.b32.xlu0 %v5256_v49, %s4534_s30  ;;  %s3727_s30 = sshll.u32 %s448_s15, 4  ;;  %s5493_s30 = int_to_ptr.vmem [resolvable:$true] %s3727_s30 }
 0x906   : > { %3167 = vrot.lane.b32.xlu0 %v5253_v24, %s4536_s25 }
 0x971   : > { %v2906_v55 = vpop.xlane.xlu1 %2905 }
 0x972   : > { %v2913_v4 = vsub.f32 %v2745_v6, %v2906_v55 }
 0x974   : > { %v2916_v57 = vmul.f32 1.442695, %v2913_v4 }
 0x975   : > { %v2909_v40 = vpop.xlane.xlu0 %2908  ;;  %v2938_v10 = vpop.permute.xlu1 %2937 }
 0x976   : > { %4433 = vpow2.f32 %v2916_v57  ;;  %v2914_v53 = vsub.f32 %v2823_v37, %v2909_v40  ;;  %4221 = vmatpush3.msra.mxu0 %v2938_v10 }
 0x977   : > { %4230 = vmatprep.subr.mxu0 %v4526_v62 }
 0x978   : > { %v2918_v46 = vmul.f32 1.442695, %v2914_v53 }
 0x979   : > { %v2912_v58 = vpop.xlane.xlu0 %2911  ;;  %v3090_v9 = vpop.permute.xlu1 %3089 }
 0x97a   : > { %4435 = vpow2.f32 %v2918_v46  ;;  %v2915_v32 = vsub.f32 %v2901_v54, %v2912_v58 }
 0x97c   : > { %v2920_v2 = vmul.f32 1.442695, %v2915_v32 }
 0x97d   : > { %v3014_v5 = vpop.permute.xlu0 %3013  ;;  %v3166_v50 = vpop.permute.xlu1 %3165 }
 0x97e   : > { %4226 = vmatpush3.msra.mxu1 %v3014_v5  ;;  %4437 = vpow2.f32 %v2920_v2 }
 0x97f   : > { %4235 = vmatprep.subr.mxu1 %v4526_v62 }
 0x980   : > { %v4434_v25 = vpop.eup %4433 }
 0x981   : > { %v2922_v14 = vsel %vm1685_vm12, %v4434_v25, 0.0  ;;  %v3168_v21 = vpop.permute.xlu0 %3167 }
 0x982   : > { %2923 = vadd.xlane.f32.xlu1 %v2922_v14 }
 0x984   : > { %v4436_v18 = vpop.eup %4435 }
 0x985   : > { %v2925_v22 = vsel %vm1685_vm12, %v4436_v18, 0.0 }
 0x986   : > { %2926 = vadd.xlane.f32.xlu0 %v2925_v22 }
 0x988   : > { %v4438_v59 = vpop.eup %4437 }
 0x989   : > { %v2928_v60 = vsel %vm1685_vm12, %v4438_v59, 0.0 }
 0x993   : > { %3323 = vrot.lane.b32.xlu1 %v5259_v41, %s4536_s25 }
 0x99c   : > { %3245 = vrot.lane.b32.xlu0 %v5256_v49, %s4536_s25 }
 0x9a0   : > { %3243 = vrot.lane.b32.xlu0 %v5256_v49, %s4535_s22 }
 0x9b7   : > { %2929 = vadd.xlane.f32.xlu1 %v2928_v60 }
 0x9c8   : > { %3321 = vrot.lane.b32.xlu1 %v5259_v41, %s4535_s22  ;;  %s3952_s22 = smul.u32 384, %s4624_s21  ;;  %s5504_s21 = scalar_lea.sflag [#allocation3], %s446_s13 }
 0xa0f   : > { %v2924_v36 = vpop.xlane.xlu1 %2923 }
 0xa10   : > { %4439 = vrcp.f32 %v2924_v36 }
 0xa13   : > { %v2927_v20 = vpop.xlane.xlu0 %2926  ;;  %v3324_v26 = vpop.permute.xlu1 %3323 }
 0xa14   : > { %4441 = vrcp.f32 %v2927_v20 }
 0xa17   : > { %v3246_v28 = vpop.permute.xlu0 %3245 }
 0xa1a   : > { %v4440_v33 = vpop.eup %4439 }
 0xa1b   : > { %v2934_v44 = vmul.f32 %v4440_v33, %v4434_v25  ;;  %v3244_v7 = vpop.permute.xlu0 %3243 }
 0xa1d   : > { %4223 = vmatmul.mubr.msk.f32.vlgmr.msra.gmra.mrb[36].mxu0 %vm1685_vm12, %v2934_v44 }
 0xa1e   : > { %v4442_v31 = vpop.eup %4441  ;;  %4231 = vmatpush3.msra.mxu0 %v3090_v9  ;;  %4232 = vmatprep.mubr.msk.f32.mxu0 %vm4525_vm4, %v4526_v62 }
 0xa1f   : > { %v2935_v63 = vmul.f32 %v4442_v31, %v4436_v18  ;;  %4240 = vmatprep.subr.mxu0 %v4526_v62 }
 0xa21   : > { %4228 = vmatmul.mubr.msk.f32.vlgmr.msra.gmra.mrb[36].mxu1 %vm1685_vm12, %v2935_v63 }
 0xa22   : > { %4236 = vmatpush3.xpose.msk.msra.mxu1 %vm1685_vm12, %v3168_v21  ;;  %4237 = vmatprep.mubr.msk.f32.mxu1 %vm4525_vm4, %v4526_v62 }
 0xa23   : > { %4245 = vmatprep.subr.mxu1 %v4526_v62 }
 0xa25   : > { %4238 = vmatmul.mubr.msk.f32.vlgmr.msra.gmra.mrb[38].mxu1 %vm1685_vm12, %v3166_v50 }
 0xa26   : > { %4246 = vmatpush3.xpose.msk.msra.mxu1 %vm1685_vm12, %v3324_v26  ;;  %4247 = vmatprep.mubr.msk.f32.mxu1 %vm4525_vm4, %v4526_v62 }
 0xa27   : > { %4255 = vmatprep.subr.mxu1 %v4526_v62 }
 0xa44   : > { %v2930_v27 = vpop.xlane.xlu1 %2929 }
 0xa45   : > { %4443 = vrcp.f32 %v2930_v27 }
 0xa48   : > { %v3322_v35 = vpop.permute.xlu1 %3321 }
 0xa49   : > { %4248 = vmatmul.mubr.msk.f32.vlgmr.msra.gmra.mrb[40].mxu1 %vm1685_vm12, %v3322_v35 }
 0xa4a   : > { %4257 = vmatprep.mubr.msk.f32.mxu1 %vm4525_vm4, %v4526_v62 }
 0xa4f   : > { %v4444_v12 = vpop.eup %4443 }
 0xa50   : > { %v2936_v56 = vmul.f32 %v4444_v12, %v4438_v59 }
 0xa52   : > { %4233 = vmatmul.mubr.msk.f32.vlgmr.msra.gmra.mrb[38].mxu0 %vm1685_vm12, %v2936_v56 }
 0xa53   : > { %4241 = vmatpush3.xpose.msk.msra.mxu0 %vm1685_vm12, %v3246_v28  ;;  %4242 = vmatprep.mubr.msk.f32.mxu0 %vm4525_vm4, %v4526_v62 }
 0xa54   : > { %4250 = vmatprep.subr.mxu0 %v4526_v62 }
 0xa56   : > { %4243 = vmatmul.mubr.msk.f32.vlgmr.msra.gmra.mrb[40].mxu0 %vm1685_vm12, %v3244_v7 }
 0xa57   : > { %4252 = vmatprep.mubr.msk.f32.mxu0 %vm4525_vm4, %v4526_v62 }
 0xaf0   : > { %v3009_v61 = vpop.f32.mrb[36].mxu0 }
 0xaf1   : > { %v4224_v29 = vpop.f32.mrb[37].mxu0 }
 0xaf4   : > { %v3085_v34 = vpop.f32.mrb[36].mxu1 }
 0xaf5   : > { %v4229_v6 = vpop.f32.mrb[37].mxu1 }
 0xaf8   : > { %v3239_v52 = vpop.f32.mrb[38].mxu1 }
 0xaf9   : > { %v3240_v16 = vadd.f32 %v3239_v52, %v5284_v13  ;;  %v4239_v3 = vpop.f32.mrb[39].mxu1 }
 0xafb   : > { %v3399_v48 = vsel %vm1685_vm12, %v3240_v16, -inf }
 0xafc   : > { %3400 = vmax.xlane.f32.xlu0 %v3399_v48 }
 0xb1c   : > { %v3395_v42 = vpop.f32.mrb[40].mxu1 }
 0xb1d   : > { %v3396_v37 = vadd.f32 %v3395_v42, %v5291_v47  ;;  %v4249_v45 = vpop.f32.mrb[41].mxu1 }
 0xb1f   : > { %v3405_v19 = vsel %vm1685_vm12, %v3396_v37, -inf }
 0xb20   : > { %3406 = vmax.xlane.f32.xlu0 %v3405_v19 }
 0xb25   : > { %v3161_v54 = vpop.f32.mrb[38].mxu0 }
 0xb26   : > { %v4234_v17 = vpop.f32.mrb[39].mxu0 }
 0xb29   : > { %v3317_v51 = vpop.f32.mrb[40].mxu0 }
 0xb2a   : > { %v3318_v55 = vadd.f32 %v3317_v51, %v5287_v15  ;;  %v4244_v4 = vpop.f32.mrb[41].mxu0 }
 0xb2c   : > { %v3402_v57 = vsel %vm1685_vm12, %v3318_v55, -inf }
 0xb2d   : > { %3403 = vmax.xlane.f32.xlu1 %v3402_v57 }
 0xb3e   : > { %3432 = vrot.lane.b32.xlu1 %v5253_v24, %s4537_s29 }
 0xb89   : > { %v3401_v13 = vpop.xlane.xlu0 %3400 }
 0xb8a   : > { %v3408_v40 = vsub.f32 %v3240_v16, %v3401_v13 }
 0xb8c   : > { %v3411_v10 = vmul.f32 1.442695, %v3408_v40 }
 0xb8e   : > { %4445 = vpow2.f32 %v3411_v10 }
 0xb98   : > { %v4446_v47 = vpop.eup %4445 }
 0xb99   : > { %v3417_v53 = vsel %vm1685_vm12, %v4446_v47, 0.0 }
 0xb9a   : > { %3418 = vadd.xlane.f32.xlu0 %v3417_v53 }
 0xbad   : > { %v3407_v46 = vpop.xlane.xlu0 %3406 }
 0xbae   : > { %v3410_v58 = vsub.f32 %v3396_v37, %v3407_v46 }
 0xbb0   : > { %v3415_v5 = vmul.f32 1.442695, %v3410_v58 }
 0xbb2   : > { %4447 = vpow2.f32 %v3415_v5 }
 0xbba   : > { %v3404_v15 = vpop.xlane.xlu1 %3403 }
 0xbbb   : > { %v3409_v25 = vsub.f32 %v3318_v55, %v3404_v15 }
 0xbbc   : > { %v4448_v14 = vpop.eup %4447 }
 0xbbd   : > { %v3413_v18 = vmul.f32 1.442695, %v3409_v25  ;;  %v3423_v22 = vsel %vm1685_vm12, %v4448_v14, 0.0 }
 0xbbe   : > { %v3433_v32 = vpop.permute.xlu1 %3432  ;;  %3424 = vadd.xlane.f32.xlu0 %v3423_v22 }
 0xbbf   : > { %4449 = vpow2.f32 %v3413_v18  ;;  %4251 = vmatpush3.msra.mxu0 %v3433_v32 }
 0xbc0   : > { %4260 = vmatprep.subr.mxu0 %v4526_v62 }
 0xbc9   : > { %v4450_v24 = vpop.eup %4449 }
 0xbca   : > { %v3420_v2 = vsel %vm1685_vm12, %v4450_v24, 0.0 }
 0xbcb   : > { %3421 = vadd.xlane.f32.xlu1 %v3420_v2 }
 0xbd4   : > { %3508 = vrot.lane.b32.xlu0 %v5256_v49, %s4537_s29 }
 0xbd8   : > { %3665 = vrot.lane.b32.xlu0 %v5397_v39, %s5558_s24 }
 0xbdc   : > { %3584 = vrot.lane.b32.xlu1 %v5259_v41, %s4537_s29  ;;  %3675 = vrot.lane.b32.xlu0 %v3009_v61, %s4539_s16 }
 0xbe0   : > { %3663 = vrot.lane.b32.xlu1 %v5395_v23, %s5558_s24  ;;  %3679 = vrot.lane.b32.xlu0 %v3161_v54, %s4539_s16 }
 0xbe4   : > { %3667 = vrot.lane.b32.xlu1 %v5399_v0, %s5558_s24  ;;  %s4462_s24 = sshll.u32 %s4541_s14, 4  ;;  %s4463_s24 = int_to_ptr.vmem [resolvable:$false] %s4462_s24 }
 0xbe5   : > { %s4464_s0 = scalar_lea.vmem %s4463_s24, 768  ;;  %p4465_p0 = scmp.lt.s32.totalorder %s5493_s30, %s4463_s24 }
 0xbe8   : > { %3677 = vrot.lane.b32.xlu1 %v3085_v34, %s4539_s16  ;;  %s5499_s16 = scalar_lea.hbm %s5557_s11, %s3952_s22 }
 0xc27   : > { %v3419_v59 = vpop.xlane.xlu0 %3418 }
 0xc28   : > { %4451 = vrcp.f32 %v3419_v59 }
 0xc32   : > { %v4452_v60 = vpop.eup %4451 }
 0xc33   : > { %v3429_v49 = vmul.f32 %v4452_v60, %v4446_v47 }
 0xc35   : > { %4253 = vmatmul.mubr.msk.f32.vlgmr.msra.gmra.mrb[42].mxu0 %vm1685_vm12, %v3429_v49 }
 0xc36   : > { %4262 = vmatprep.mubr.msk.f32.mxu0 %vm4525_vm4, %v4526_v62  ;;  %vm3699_vm4 = vcmask 130048  }
 0xc4b   : > { %v3425_v41 = vpop.xlane.xlu0 %3424 }
 0xc4c   : > { %4453 = vrcp.f32 %v3425_v41 }
 0xc4f   : > { %v3509_v39 = vpop.permute.xlu0 %3508 }
 0xc50   : > { %4256 = vmatpush3.msra.mxu1 %v3509_v39 }
 0xc53   : > { %v3666_v35 = vpop.permute.xlu0 %3665 }
 0xc56   : > { %v4454_v23 = vpop.eup %4453 }
 0xc57   : > { %v3431_v50 = vmul.f32 %v4454_v23, %v4448_v14  ;;  %v3676_v56 = vpop.permute.xlu0 %3675 }
 0xc58   : > { %v3422_v9 = vpop.xlane.xlu1 %3421 }
 0xc59   : > { %4455 = vrcp.f32 %v3422_v9 }
 0xc5c   : > { %v3585_v21 = vpop.permute.xlu1 %3584 }
 0xc5d   : > { %4261 = vmatpush3.msra.mxu0 %v3585_v21 }
 0xc5e   : > { %4263 = vmatmul.mubr.msk.f32.vlgmr.msra.gmra.mrb[44].mxu0 %vm1685_vm12, %v3431_v50 }
 0xc60   : > { %v3664_v26 = vpop.permute.xlu1 %3663 }
 0xc61   : > { %v3696_v28 = vsel %vm1685_vm12, %v5338_v43, %v3664_v26  ;;  %v3680_v43 = vpop.permute.xlu0 %3679 }
 0xc62   : > { %v3700_v61 = vsel %vm3699_vm4, %v3696_v28, %v3676_v56 }
 0xc63   : > { %v4456_v0 = vpop.eup %4455 }
 0xc64   : > { %v3430_v36 = vmul.f32 %v4456_v0, %v4450_v24  ;;  %v3668_v27 = vpop.permute.xlu1 %3667 }
 0xc65   : > { %v3698_v6 = vsel %vm1685_vm12, %v5346_v11, %v3668_v27 }
 0xc66   : > { %4258 = vmatmul.mubr.msk.f32.vlgmr.msra.gmra.mrb[42].mxu1 %vm1685_vm12, %v3430_v36  ;;  %v3702_v16 = vsel %vm3699_vm4, %v3698_v6, %v3680_v43 }
 0xc68   : > { %v3678_v12 = vpop.permute.xlu1 %3677 }
 0xd08   : > { %v3504_v20 = vpop.f32.mrb[42].mxu0 }
 0xd09   : > { %3687 = vrot.lane.b32.xlu1 %v3504_v20, %s4540_s12  ;;  %v4254_v62 = vpop.f32.mrb[43].mxu0 }
 0xd31   : > { %v3656_v33 = vpop.f32.mrb[44].mxu0 }
 0xd32   : > { %3691 = vrot.lane.b32.xlu1 %v3656_v33, %s4540_s12  ;;  %v4264_v44 = vpop.f32.mrb[45].mxu0 }
 0xd39   : > { %v3580_v31 = vpop.f32.mrb[42].mxu1 }
 0xd3a   : > { %3689 = vrot.lane.b32.xlu0 %v3580_v31, %s4540_s12  ;;  %v4259_v63 = vpop.f32.mrb[43].mxu1  ;;  %s4458_s12 = scalar_lea.vmem %s5493_s30, 384 }
 0xd3b   : > { %p4459_p11 = scmp.ne.s32.totalorder %s5493_s30, %s4458_s12  ;;  %p4466_p1 = scmp.lt.s32.totalorder %s4464_s0, %s4458_s12 }
 0xd3d   : > { %p4460_p12 = pnand %p4459_p11, %p4641_p5  ;;  %p4467_p2 = por %p4466_p1, %p4465_p0 }
 0xd3f   : > { %p4461_p13 = pneg %p4460_p12 }
 0xd41   : > { %p4468_p3 = pnand %p4467_p2, %p4461_p13 }
 0xd7b   : > { %v3688_v7 = vpop.permute.xlu1 %3687 }
 0xd7c   : > { %v3704_v29 = vsel %vm3703_vm13, %v3700_v61, %v3688_v7 }
 0xd7d   : > { %v3707_v34 = vadd.f32 %v3704_v29, %v5233_v8  ;;  %v3697_v8 = vsel %vm1685_vm12, %v5340_v38, %v3666_v35 }
 0xd7e   : > { %v3701_v42 = vsel %vm3699_vm4, %v3697_v8, %v3678_v12 }
 0xd7f   : > { %3710 = vst.msk [vmem:[%s448_s15] sm:$0xff] %vm1142_vm6, %v3707_v34 }
 0xda4   : > { %v3692_v52 = vpop.permute.xlu1 %3691 }
 0xda5   : > { %v3706_v3 = vsel %vm3703_vm13, %v3702_v16, %v3692_v52 }
 0xda6   : > { %v3709_v48 = vadd.f32 %v3706_v3, %v5247_v30 }
 0xda8   : > { %3712 = vst.msk [vmem:[%s448_s15 + $0x10] sm:$0xff] %vm1142_vm6, %v3709_v48 }
 0xdac   : > { %v3690_v11 = vpop.permute.xlu0 %3689 }
 0xdad   : > { %v3705_v37 = vsel %vm3703_vm13, %v3701_v42, %v3690_v11 }
 0xdae   : > { %v3708_v45 = vadd.f32 %v3705_v37, %v5240_v1 }
 0xdb0   : > { %3711 = vst.msk [vmem:[%s448_s15 + $0x8] sm:$0xff] %vm1142_vm6, %v3708_v45 }
 0xdb1   : > { %4471 = shalt.err (!%p4468_p3)
}
 0xdb2   : > { %s4472_s13 = scalar_lea.hbm %s5499_s16, 384  ;;  %s4476_s25 = scalar_lea.hbm %s5557_s11, 768 }
 0xdb3   : > { %p4473_p4 = scmp.ne.s32.totalorder %s5499_s16, %s4472_s13  ;;  %p4477_p9 = scmp.lt.u32.totalorder %s5499_s16, %s5557_s11 }
 0xdb4   : > { %p4478_p10 = scmp.lt.u32.totalorder %s4476_s25, %s4472_s13  ;;  %p4480_p12 = scmp.lt.u32.totalorder %s4472_s13, %s5499_s16 }
 0xdb5   : > { %p4474_p7 = pnand %p4473_p4, %p4641_p5 }
 0xdb6   : > { %p4479_p11 = por %p4478_p10, %p4477_p9 }
 0xdb7   : > { %p4475_p8 = pneg %p4474_p7 }
 0xdb8   : > { %p4481_p13 = por %p4480_p12, %p4479_p11 }
 0xdba   : > { %p4482_p0 = pnand %p4481_p13, %p4475_p8 }
 0xdbc   : > { %4485 = shalt.err (!%p4482_p0)
}
 0xdbd   : > { %s4542_s0 = smov 128   ;;  %s5563_s12 = smov 8  }
 0xdbe   : > { %4294 = dma.vmem_to_hbm [thread:$0]  (%p4641_p5), %s5493_s30, 384, %s5499_s16, %s5504_s21, %s4542_s0, %s4542_s0, %s5563_s12  }
 0xdbf PF: > { %p4300_p1 = scmp.ge.s32.totalorder %s4520_s20, 2  ;;  %s3742_s14 = sand.u32 1, %s4508_s17  }
 0xdc0   : > { %s3743_s13 = scalar_lea.sflag [#allocation3], %s3742_s14 }
 0xdc1   : > { %p4297_p2 = pnand %p4300_p1, %p4645_p6 }
 0xdc3   : > { %4503 = dma.done.wait (!%p4297_p2), %s3743_s13, 384  }
 0xdc4   : > { %4505 = vsyncadd (!%p4297_p2), %s3743_s13, 4294966912  ;;  %p21_p3 = scmp.ge.s32.totalorder %s4628_s23, 4   ;;  %s5564_s17 = smov %s4512_s18 }
 0xdc5   : > { %s5565_s18 = smov %s4516_s19  ;;  %s5566_s19 = smov %s4639_s26 }
 0xdc6   : > { %s5567_s20 = smov %s4628_s23  ;;  %23 = sbr.rel (!%p21_p3) target bundleno = 5 (0x5), region = 111 }
 0xdcd   :  { %3748 = vsyncpa [#allocation3], 1 }
 0xdce   :  { %3750 = vsyncpa [#allocation3 + $0x1], 1 }

</bundles_post_ra>
